<compile_context>
chip_gen: v7x
topology: tpu7x:2x2x1
jax: 0.10.0
libtpu: 0.0.40
codegen_flags: <defaults>
</compile_context>

<pallas_src>
import functools

import jax
import jax.numpy as jnp
import numpy as np
from jax.experimental import pallas as pl
from jax.experimental.pallas import tpu as pltpu

EPS = 1e-5
NEG_SLOPE = 0.1


def _leaky(x):
    return jnp.where(x > 0, x, NEG_SLOPE * x)


def darknet_block_kernel(inv_cnt, x_ref, w1_ref, w2_ref, gb1_ref, gb2_ref,
                         m1_ref, m2_ref, s1_ref, s1t_ref, s2_ref, s2t_ref,
                         o_ref):
    # x_ref : (R, Lin)    zero-padded input rows, R = N*(H+2), Lin = (W+2)*Cin, f32
    # w1_ref: (Lin, L1)   block-diagonal 1x1-conv weight, bf16, L1 = (W+2)*C1
    # w2_ref: (3, L1, L2) row-Toeplitz 3x3-conv weights (one per dy), bf16
    # gb1/gb2: (2, C1)/(2, C2) f32 -- gamma in row 0, beta in row 1
    # m1/m2 : (R, L1)/(R, L2) f32 interior masks (zero on the padding ring)
    # s1/s1t: (L1, C1)/(C1, L1) 0/1 lane->channel fold / channel->lane broadcast
    # s2/s2t: (L2, C2)/(C2, L2) ditto for the second BN
    # o_ref : (R, L2) f32
    f32 = jnp.float32
    x = x_ref[...]                                                      # (R, Lin)

    # ---- 1x1 conv: bf16 MXU operands, f32 accumulation ----
    h = jnp.dot(x.astype(jnp.bfloat16), w1_ref[...],
                preferred_element_type=f32)                             # (R, L1)

    # ---- bn1 batch statistics (padding ring of x is zero -> contributes 0) ----
    col_s = jnp.sum(h, axis=0, keepdims=True)                           # (1, L1)
    col_q = jnp.sum(h * h, axis=0, keepdims=True)                       # (1, L1)
    ch_s = jnp.dot(col_s, s1_ref[...], preferred_element_type=f32)      # (1, C1)
    ch_q = jnp.dot(col_q, s1_ref[...], preferred_element_type=f32)
    gb1 = gb1_ref[...]
    mean1 = ch_s * inv_cnt
    var1 = jnp.maximum(ch_q * inv_cnt - mean1 * mean1, 0.0)             # biased var
    scale1 = gb1[0:1, :] * jax.lax.rsqrt(var1 + EPS)
    shift1 = gb1[1:2, :] - mean1 * scale1
    sc1 = jnp.dot(scale1, s1t_ref[...], preferred_element_type=f32)     # (1, L1)
    sh1 = jnp.dot(shift1, s1t_ref[...], preferred_element_type=f32)

    # ---- bn1 fold + LeakyReLU, then zero the conv-padding ring ----
    a = _leaky(h * sc1 + sh1) * m1_ref[...]                             # (R, L1)

    # ---- 3x3 conv: three row-shifted bf16 matmuls vs row-Toeplitz weights ----
    # roll wrap-around only touches masked padding rows / discarded border rows.
    rows = a.shape[0]
    a0 = a.astype(jnp.bfloat16)
    am1 = pltpu.roll(a, shift=1, axis=0).astype(jnp.bfloat16)           # row r-1
    ap1 = pltpu.roll(a, shift=rows - 1, axis=0).astype(jnp.bfloat16)    # row r+1
    y = jnp.dot(am1, w2_ref[0], preferred_element_type=f32)
    y = y + jnp.dot(a0, w2_ref[1], preferred_element_type=f32)
    y = y + jnp.dot(ap1, w2_ref[2], preferred_element_type=f32)         # (R, L2)

    # ---- bn2 batch statistics over interior pixels only ----
    ym = y * m2_ref[...]                                                # border -> 0
    col_s2 = jnp.sum(ym, axis=0, keepdims=True)
    col_q2 = jnp.sum(ym * ym, axis=0, keepdims=True)
    ch_s2 = jnp.dot(col_s2, s2_ref[...], preferred_element_type=f32)    # (1, C2)
    ch_q2 = jnp.dot(col_q2, s2_ref[...], preferred_element_type=f32)
    gb2 = gb2_ref[...]
    mean2 = ch_s2 * inv_cnt
    var2 = jnp.maximum(ch_q2 * inv_cnt - mean2 * mean2, 0.0)
    scale2 = gb2[0:1, :] * jax.lax.rsqrt(var2 + EPS)
    shift2 = gb2[1:2, :] - mean2 * scale2
    sc2 = jnp.dot(scale2, s2t_ref[...], preferred_element_type=f32)     # (1, L2)
    sh2 = jnp.dot(shift2, s2t_ref[...], preferred_element_type=f32)

    # ---- bn2 fold + LeakyReLU + residual (Cin == C2, identical lane layout) ----
    o_ref[...] = (_leaky(ym * sc2 + sh2) + x).astype(o_ref.dtype)


@jax.jit
def darknet_block(x_nchw, w1_oihw, g1, b1, w2_oihw, g2, b2):
    """DarknetBlock forward (width_mult = 1.0, training-mode batch norm)."""
    N, Cin, H, W = x_nchw.shape
    C1 = w1_oihw.shape[0]
    C2 = w2_oihw.shape[0]
    assert C2 == Cin, "residual add requires planes[1] == inplanes"

    R = N * (H + 2)                    # total padded rows in the batch
    Lin = (W + 2) * Cin                # input lanes per padded row
    L1 = (W + 2) * C1                  # conv1-activation lanes per row
    L2 = (W + 2) * C2                  # conv2-output lanes per row
    inv_cnt = 1.0 / float(N * H * W)   # BN statistics count (interior pixels)
    f32, bf16 = jnp.float32, jnp.bfloat16

    # whole-batch-resident fused kernel; everything here is a few 10s of KiB.
    vmem_est = 4 * R * (Lin + 2 * L1 + 2 * L2) + 2 * (Lin * L1 + 3 * L1 * L2)
    assert vmem_est < 8 * 1024 * 1024, "batch too large for the fused path"

    # NCHW -> zero-padded channels-last rows (pure views after the pad).
    x_pad = jnp.pad(jnp.transpose(x_nchw, (0, 2, 3, 1)),
                    ((0, 0), (1, 1), (1, 1), (0, 0)))
    x_rows = x_pad.reshape(R, Lin).astype(f32)

    # 1x1 conv as one block-diagonal matmul weight in the (w, c) lane layout.
    w1_mat = jnp.transpose(w1_oihw.reshape(C1, Cin), (1, 0))            # (Cin, C1)
    eye_w = jnp.eye(W + 2, dtype=f32)
    w1_bd = (eye_w[:, None, :, None] * w1_mat[None, :, None, :]
             ).reshape(Lin, L1).astype(bf16)                            # (Lin, L1)

    # 3x3 conv as three row-Toeplitz matmul weights (one per row offset dy).
    wi = jnp.arange(W + 2)
    dxm = wi[:, None] - wi[None, :]                                     # w_in - w_out
    valid = (jnp.abs(dxm) <= 1).astype(f32)
    dx_idx = jnp.clip(dxm + 1, 0, 2)
    w2_k = jnp.transpose(w2_oihw, (2, 3, 1, 0))                         # (ky, kx, C1, C2)
    w2_t = jnp.stack(
        [jnp.transpose(w2_k[k][dx_idx] * valid[:, :, None, None],
                       (0, 2, 1, 3)).reshape(L1, L2) for k in range(3)],
        axis=0).astype(bf16)                                            # (3, L1, L2)

    # Interior masks: zero the conv-padding ring / exclude it from BN stats.
    row_in = ((jnp.arange(H + 2) >= 1) & (jnp.arange(H + 2) <= H)).astype(f32)
    col_in = ((jnp.arange(W + 2) >= 1) & (jnp.arange(W + 2) <= W)).astype(f32)
    m_hw = row_in[:, None] * col_in[None, :]                            # (H+2, W+2)
    m1 = jnp.tile(jnp.repeat(m_hw, C1, axis=1), (N, 1))                 # (R, L1)
    m2 = jnp.tile(jnp.repeat(m_hw, C2, axis=1), (N, 1))                 # (R, L2)

    # 0/1 fold ((W+2)*C -> C) and broadcast (C -> (W+2)*C) matrices so BN never
    # needs a cross-lane reshape inside the kernel.
    s1 = (jnp.arange(L1)[:, None] % C1 == jnp.arange(C1)[None, :]).astype(f32)
    s2 = (jnp.arange(L2)[:, None] % C2 == jnp.arange(C2)[None, :]).astype(f32)

    gb1 = jnp.stack([g1, b1], axis=0).astype(f32)                       # (2, C1)
    gb2 = jnp.stack([g2, b2], axis=0).astype(f32)                       # (2, C2)

    full = lambda shape: pl.BlockSpec(shape, lambda i: (0,) * len(shape))

    out_rows = pl.pallas_call(
        functools.partial(darknet_block_kernel, inv_cnt),
        grid=(1,),
        in_specs=[full((R, Lin)), full((Lin, L1)), full((3, L1, L2)),
                  full((2, C1)), full((2, C2)),
                  full((R, L1)), full((R, L2)),
                  full((L1, C1)), full((C1, L1)),
                  full((L2, C2)), full((C2, L2))],
        out_specs=full((R, L2)),
        out_shape=jax.ShapeDtypeStruct((R, L2), f32),
        compiler_params=pltpu.CompilerParams(
            dimension_semantics=("arbitrary",)),
        cost_estimate=pl.CostEstimate(
            flops=2 * R * (Lin * L1 + 3 * L1 * L2),
            transcendentals=2 * (C1 + C2),
            bytes_accessed=4 * R * (Lin + L1 + 2 * L2)
                           + 2 * (Lin * L1 + 3 * L1 * L2)),
    )(x_rows, w1_bd, w2_t, gb1, gb2, m1, m2,
      s1, jnp.transpose(s1), s2, jnp.transpose(s2))

    out = out_rows.reshape(N, H + 2, W + 2, C2)[:, 1:H + 1, 1:W + 1, :]
    return jnp.transpose(out, (0, 3, 1, 2)).astype(x_nchw.dtype)


def darknet_block_reference(x, w1, g1, b1, w2, g2, b2):
    """Pure-JAX NCHW reference mirroring the PyTorch forward (training-mode BN)."""
    def bn(h, g, b):
        m = h.mean(axis=(0, 2, 3), keepdims=True)
        v = ((h - m) ** 2).mean(axis=(0, 2, 3), keepdims=True)
        return (h - m) * jax.lax.rsqrt(v + EPS) * g.reshape(1, -1, 1, 1) \
            + b.reshape(1, -1, 1, 1)

    dn = ('NCHW', 'OIHW', 'NCHW')
    h = jax.lax.conv_general_dilated(x, w1, (1, 1), 'VALID', dimension_numbers=dn)
    h = _leaky(bn(h, g1, b1))
    y = jax.lax.conv_general_dilated(h, w2, (1, 1), ((1, 1), (1, 1)),
                                     dimension_numbers=dn)
    y = _leaky(bn(y, g2, b2))
    return y + x


if __name__ == "__main__":
    key = jax.random.PRNGKey(0)
    k_x, k_w1, k_w2, k_g1, k_b1, k_g2, k_b2 = jax.random.split(key, 7)

    # DarknetBlock(inplanes=4, planes=[8, 4]); residual needs planes[1] == inplanes.
    N, Cin, H, W = 2, 4, 16, 16
    C1, C2 = 8, 4

    x = jax.random.normal(k_x, (N, Cin, H, W), jnp.float32)
    w1 = 0.2 * jax.random.normal(k_w1, (C1, Cin, 1, 1), jnp.float32)   # conv1 weight
    w2 = 0.1 * jax.random.normal(k_w2, (C2, C1, 3, 3), jnp.float32)    # project_conv weight
    g1 = 1.0 + 0.1 * jax.random.normal(k_g1, (C1,), jnp.float32)       # bn1 gamma
    b1 = 0.1 * jax.random.normal(k_b1, (C1,), jnp.float32)             # bn1 beta
    g2 = 1.0 + 0.1 * jax.random.normal(k_g2, (C2,), jnp.float32)       # project_bn gamma
    b2 = 0.1 * jax.random.normal(k_b2, (C2,), jnp.float32)             # project_bn beta

    out = jax.block_until_ready(darknet_block(x, w1, g1, b1, w2, g2, b2))
    ref = jax.block_until_ready(darknet_block_reference(x, w1, g1, b1, w2, g2, b2))

    np.testing.assert_allclose(np.asarray(out), np.asarray(ref), atol=5e-2, rtol=5e-2)
    print("KERNEL_OK")
</pallas_src>

<mosaic_0001>
module attributes {stable_mosaic.version = 11 : i64} {
  func.func @darknet_block_kernel(%arg0: i32, %arg1: memref<36x72xf32, #tpu.memory_space<vmem>>, %arg2: memref<72x144xbf16, #tpu.memory_space<vmem>>, %arg3: memref<3x144x72xbf16, #tpu.memory_space<vmem>>, %arg4: memref<2x8xf32, #tpu.memory_space<vmem>>, %arg5: memref<2x4xf32, #tpu.memory_space<vmem>>, %arg6: memref<36x144xf32, #tpu.memory_space<vmem>>, %arg7: memref<36x72xf32, #tpu.memory_space<vmem>>, %arg8: memref<144x8xf32, #tpu.memory_space<vmem>>, %arg9: memref<8x144xf32, #tpu.memory_space<vmem>>, %arg10: memref<72x4xf32, #tpu.memory_space<vmem>>, %arg11: memref<4x72xf32, #tpu.memory_space<vmem>>, %arg12: memref<36x72xf32, #tpu.memory_space<vmem>>) attributes {dimension_semantics = [#tpu.dimension_semantics<arbitrary>], iteration_bounds = array<i64: 1>, scalar_prefetch = 0 : i64, scratch_operands = 0 : i64, tpu.core_type = #tpu.core_type<tc>, window_params = [{pipeline_mode = #tpu.pipeline_mode<synchronous>, transform_indices = @transform_0, window_bounds = array<i64: 36, 72>}, {pipeline_mode = #tpu.pipeline_mode<synchronous>, transform_indices = @transform_1, window_bounds = array<i64: 72, 144>}, {pipeline_mode = #tpu.pipeline_mode<synchronous>, transform_indices = @transform_2, window_bounds = array<i64: 3, 144, 72>}, {pipeline_mode = #tpu.pipeline_mode<synchronous>, transform_indices = @transform_3, window_bounds = array<i64: 2, 8>}, {pipeline_mode = #tpu.pipeline_mode<synchronous>, transform_indices = @transform_4, window_bounds = array<i64: 2, 4>}, {pipeline_mode = #tpu.pipeline_mode<synchronous>, transform_indices = @transform_5, window_bounds = array<i64: 36, 144>}, {pipeline_mode = #tpu.pipeline_mode<synchronous>, transform_indices = @transform_6, window_bounds = array<i64: 36, 72>}, {pipeline_mode = #tpu.pipeline_mode<synchronous>, transform_indices = @transform_7, window_bounds = array<i64: 144, 8>}, {pipeline_mode = #tpu.pipeline_mode<synchronous>, transform_indices = @transform_8, window_bounds = array<i64: 8, 144>}, {pipeline_mode = #tpu.pipeline_mode<synchronous>, transform_indices = @transform_9, window_bounds = array<i64: 72, 4>}, {pipeline_mode = #tpu.pipeline_mode<synchronous>, transform_indices = @transform_10, window_bounds = array<i64: 4, 72>}, {pipeline_mode = #tpu.pipeline_mode<synchronous>, transform_indices = @transform_11, window_bounds = array<i64: 36, 72>}]} {
    %c0 = arith.constant 0 : index
    %c0_0 = arith.constant 0 : index
    %0 = vector.load %arg1[%c0, %c0_0] : memref<36x72xf32, #tpu.memory_space<vmem>>, vector<36x72xf32>
    %1 = arith.truncf %0 : vector<36x72xf32> to vector<36x72xbf16>
    %c0_1 = arith.constant 0 : index
    %c0_2 = arith.constant 0 : index
    %2 = vector.load %arg2[%c0_1, %c0_2] : memref<72x144xbf16, #tpu.memory_space<vmem>>, vector<72x144xbf16>
    %cst = arith.constant dense<0.000000e+00> : vector<36x144xf32>
    %3 = tpu.matmul %1, %2, %cst {dimension_numbers = #tpu.dot_dimension_numbers<[1], [0], [0], [1], [0, 0, 1, 1], [], []>} : vector<36x72xbf16>, vector<72x144xbf16>, vector<36x144xf32> -> vector<36x144xf32>
    %cst_3 = arith.constant dense<0.000000e+00> : vector<144xf32>
    %4 = vector.multi_reduction <add>, %3, %cst_3 [0] : vector<36x144xf32> to vector<144xf32>
    %5 = vector.shape_cast %4 : vector<144xf32> to vector<1x144xf32>
    %6 = arith.mulf %3, %3 : vector<36x144xf32>
    %cst_4 = arith.constant dense<0.000000e+00> : vector<144xf32>
    %7 = vector.multi_reduction <add>, %6, %cst_4 [0] : vector<36x144xf32> to vector<144xf32>
    %8 = vector.shape_cast %7 : vector<144xf32> to vector<1x144xf32>
    %c0_5 = arith.constant 0 : index
    %c0_6 = arith.constant 0 : index
    %9 = vector.load %arg8[%c0_5, %c0_6] : memref<144x8xf32, #tpu.memory_space<vmem>>, vector<144x8xf32>
    %cst_7 = arith.constant dense<0.000000e+00> : vector<1x8xf32>
    %10 = tpu.matmul %5, %9, %cst_7 {dimension_numbers = #tpu.dot_dimension_numbers<[1], [0], [0], [1], [0, 0, 1, 1], [], []>} : vector<1x144xf32>, vector<144x8xf32>, vector<1x8xf32> -> vector<1x8xf32>
    %c0_8 = arith.constant 0 : index
    %c0_9 = arith.constant 0 : index
    %11 = vector.load %arg8[%c0_8, %c0_9] : memref<144x8xf32, #tpu.memory_space<vmem>>, vector<144x8xf32>
    %cst_10 = arith.constant dense<0.000000e+00> : vector<1x8xf32>
    %12 = tpu.matmul %8, %11, %cst_10 {dimension_numbers = #tpu.dot_dimension_numbers<[1], [0], [0], [1], [0, 0, 1, 1], [], []>} : vector<1x144xf32>, vector<144x8xf32>, vector<1x8xf32> -> vector<1x8xf32>
    %c0_11 = arith.constant 0 : index
    %c0_12 = arith.constant 0 : index
    %13 = vector.load %arg4[%c0_11, %c0_12] : memref<2x8xf32, #tpu.memory_space<vmem>>, vector<2x8xf32>
    %cst_13 = arith.constant 0.001953125 : f32
    %14 = vector.broadcast %cst_13 : f32 to vector<1x8xf32>
    %15 = arith.mulf %10, %14 : vector<1x8xf32>
    %cst_14 = arith.constant 0.001953125 : f32
    %16 = vector.broadcast %cst_14 : f32 to vector<1x8xf32>
    %17 = arith.mulf %12, %16 : vector<1x8xf32>
    %18 = arith.mulf %15, %15 : vector<1x8xf32>
    %19 = arith.subf %17, %18 : vector<1x8xf32>
    %cst_15 = arith.constant 0.000000e+00 : f32
    %20 = vector.broadcast %cst_15 : f32 to vector<1x8xf32>
    %21 = arith.maximumf %19, %20 : vector<1x8xf32>
    %22 = vector.extract_strided_slice %13 {offsets = [0, 0], sizes = [1, 8], strides = [1, 1]} : vector<2x8xf32> to vector<1x8xf32>
    %cst_16 = arith.constant 9.99999974E-6 : f32
    %23 = vector.broadcast %cst_16 : f32 to vector<1x8xf32>
    %24 = arith.addf %21, %23 : vector<1x8xf32>
    %25 = math.rsqrt %24 : vector<1x8xf32>
    %26 = arith.mulf %22, %25 : vector<1x8xf32>
    %27 = vector.extract_strided_slice %13 {offsets = [1, 0], sizes = [1, 8], strides = [1, 1]} : vector<2x8xf32> to vector<1x8xf32>
    %28 = arith.mulf %15, %26 : vector<1x8xf32>
    %29 = arith.subf %27, %28 : vector<1x8xf32>
    %c0_17 = arith.constant 0 : index
    %c0_18 = arith.constant 0 : index
    %30 = vector.load %arg9[%c0_17, %c0_18] : memref<8x144xf32, #tpu.memory_space<vmem>>, vector<8x144xf32>
    %cst_19 = arith.constant dense<0.000000e+00> : vector<1x144xf32>
    %31 = tpu.matmul %26, %30, %cst_19 {dimension_numbers = #tpu.dot_dimension_numbers<[1], [0], [0], [1], [0, 0, 1, 1], [], []>} : vector<1x8xf32>, vector<8x144xf32>, vector<1x144xf32> -> vector<1x144xf32>
    %c0_20 = arith.constant 0 : index
    %c0_21 = arith.constant 0 : index
    %32 = vector.load %arg9[%c0_20, %c0_21] : memref<8x144xf32, #tpu.memory_space<vmem>>, vector<8x144xf32>
    %cst_22 = arith.constant dense<0.000000e+00> : vector<1x144xf32>
    %33 = tpu.matmul %29, %32, %cst_22 {dimension_numbers = #tpu.dot_dimension_numbers<[1], [0], [0], [1], [0, 0, 1, 1], [], []>} : vector<1x8xf32>, vector<8x144xf32>, vector<1x144xf32> -> vector<1x144xf32>
    %34 = vector.broadcast %31 : vector<1x144xf32> to vector<36x144xf32>
    %35 = arith.mulf %3, %34 : vector<36x144xf32>
    %36 = vector.broadcast %33 : vector<1x144xf32> to vector<36x144xf32>
    %37 = arith.addf %35, %36 : vector<36x144xf32>
    %cst_23 = arith.constant 0.000000e+00 : f32
    %38 = vector.broadcast %cst_23 : f32 to vector<36x144xf32>
    %39 = arith.cmpf ogt, %37, %38 : vector<36x144xf32>
    %cst_24 = arith.constant 1.000000e-01 : f32
    %40 = vector.broadcast %cst_24 : f32 to vector<36x144xf32>
    %41 = arith.mulf %40, %37 : vector<36x144xf32>
    %42 = arith.select %39, %37, %41 : vector<36x144xi1>, vector<36x144xf32>
    %c0_25 = arith.constant 0 : index
    %c0_26 = arith.constant 0 : index
    %43 = vector.load %arg6[%c0_25, %c0_26] : memref<36x144xf32, #tpu.memory_space<vmem>>, vector<36x144xf32>
    %44 = arith.mulf %42, %43 : vector<36x144xf32>
    %45 = arith.truncf %44 : vector<36x144xf32> to vector<36x144xbf16>
    %c1_i32 = arith.constant 1 : i32
    %46 = tpu.dynamic_rotate %44 by %c1_i32 dim 0 : vector<36x144xf32>, i32 -> vector<36x144xf32>
    %47 = arith.truncf %46 : vector<36x144xf32> to vector<36x144xbf16>
    %c35_i32 = arith.constant 35 : i32
    %48 = tpu.dynamic_rotate %44 by %c35_i32 dim 0 : vector<36x144xf32>, i32 -> vector<36x144xf32>
    %49 = arith.truncf %48 : vector<36x144xf32> to vector<36x144xbf16>
    %c0_27 = arith.constant 0 : index
    %c0_28 = arith.constant 0 : index
    %c0_29 = arith.constant 0 : index
    %50 = vector.load %arg3[%c0_27, %c0_28, %c0_29] : memref<3x144x72xbf16, #tpu.memory_space<vmem>>, vector<1x144x72xbf16>
    %51 = vector.shape_cast %50 : vector<1x144x72xbf16> to vector<144x72xbf16>
    %cst_30 = arith.constant dense<0.000000e+00> : vector<36x72xf32>
    %52 = tpu.matmul %47, %51, %cst_30 {dimension_numbers = #tpu.dot_dimension_numbers<[1], [0], [0], [1], [0, 0, 1, 1], [], []>} : vector<36x144xbf16>, vector<144x72xbf16>, vector<36x72xf32> -> vector<36x72xf32>
    %c1 = arith.constant 1 : index
    %c0_31 = arith.constant 0 : index
    %c0_32 = arith.constant 0 : index
    %53 = vector.load %arg3[%c1, %c0_31, %c0_32] : memref<3x144x72xbf16, #tpu.memory_space<vmem>>, vector<1x144x72xbf16>
    %54 = vector.shape_cast %53 : vector<1x144x72xbf16> to vector<144x72xbf16>
    %cst_33 = arith.constant dense<0.000000e+00> : vector<36x72xf32>
    %55 = tpu.matmul %45, %54, %cst_33 {dimension_numbers = #tpu.dot_dimension_numbers<[1], [0], [0], [1], [0, 0, 1, 1], [], []>} : vector<36x144xbf16>, vector<144x72xbf16>, vector<36x72xf32> -> vector<36x72xf32>
    %56 = arith.addf %52, %55 : vector<36x72xf32>
    %c2 = arith.constant 2 : index
    %c0_34 = arith.constant 0 : index
    %c0_35 = arith.constant 0 : index
    %57 = vector.load %arg3[%c2, %c0_34, %c0_35] : memref<3x144x72xbf16, #tpu.memory_space<vmem>>, vector<1x144x72xbf16>
    %58 = vector.shape_cast %57 : vector<1x144x72xbf16> to vector<144x72xbf16>
    %cst_36 = arith.constant dense<0.000000e+00> : vector<36x72xf32>
    %59 = tpu.matmul %49, %58, %cst_36 {dimension_numbers = #tpu.dot_dimension_numbers<[1], [0], [0], [1], [0, 0, 1, 1], [], []>} : vector<36x144xbf16>, vector<144x72xbf16>, vector<36x72xf32> -> vector<36x72xf32>
    %60 = arith.addf %56, %59 : vector<36x72xf32>
    %c0_37 = arith.constant 0 : index
    %c0_38 = arith.constant 0 : index
    %61 = vector.load %arg7[%c0_37, %c0_38] : memref<36x72xf32, #tpu.memory_space<vmem>>, vector<36x72xf32>
    %62 = arith.mulf %60, %61 : vector<36x72xf32>
    %cst_39 = arith.constant dense<0.000000e+00> : vector<72xf32>
    %63 = vector.multi_reduction <add>, %62, %cst_39 [0] : vector<36x72xf32> to vector<72xf32>
    %64 = vector.shape_cast %63 : vector<72xf32> to vector<1x72xf32>
    %65 = arith.mulf %62, %62 : vector<36x72xf32>
    %cst_40 = arith.constant dense<0.000000e+00> : vector<72xf32>
    %66 = vector.multi_reduction <add>, %65, %cst_40 [0] : vector<36x72xf32> to vector<72xf32>
    %67 = vector.shape_cast %66 : vector<72xf32> to vector<1x72xf32>
    %c0_41 = arith.constant 0 : index
    %c0_42 = arith.constant 0 : index
    %68 = vector.load %arg10[%c0_41, %c0_42] : memref<72x4xf32, #tpu.memory_space<vmem>>, vector<72x4xf32>
    %cst_43 = arith.constant dense<0.000000e+00> : vector<1x4xf32>
    %69 = tpu.matmul %64, %68, %cst_43 {dimension_numbers = #tpu.dot_dimension_numbers<[1], [0], [0], [1], [0, 0, 1, 1], [], []>} : vector<1x72xf32>, vector<72x4xf32>, vector<1x4xf32> -> vector<1x4xf32>
    %c0_44 = arith.constant 0 : index
    %c0_45 = arith.constant 0 : index
    %70 = vector.load %arg10[%c0_44, %c0_45] : memref<72x4xf32, #tpu.memory_space<vmem>>, vector<72x4xf32>
    %cst_46 = arith.constant dense<0.000000e+00> : vector<1x4xf32>
    %71 = tpu.matmul %67, %70, %cst_46 {dimension_numbers = #tpu.dot_dimension_numbers<[1], [0], [0], [1], [0, 0, 1, 1], [], []>} : vector<1x72xf32>, vector<72x4xf32>, vector<1x4xf32> -> vector<1x4xf32>
    %c0_47 = arith.constant 0 : index
    %c0_48 = arith.constant 0 : index
    %72 = vector.load %arg5[%c0_47, %c0_48] : memref<2x4xf32, #tpu.memory_space<vmem>>, vector<2x4xf32>
    %cst_49 = arith.constant 0.001953125 : f32
    %73 = vector.broadcast %cst_49 : f32 to vector<1x4xf32>
    %74 = arith.mulf %69, %73 : vector<1x4xf32>
    %cst_50 = arith.constant 0.001953125 : f32
    %75 = vector.broadcast %cst_50 : f32 to vector<1x4xf32>
    %76 = arith.mulf %71, %75 : vector<1x4xf32>
    %77 = arith.mulf %74, %74 : vector<1x4xf32>
    %78 = arith.subf %76, %77 : vector<1x4xf32>
    %cst_51 = arith.constant 0.000000e+00 : f32
    %79 = vector.broadcast %cst_51 : f32 to vector<1x4xf32>
    %80 = arith.maximumf %78, %79 : vector<1x4xf32>
    %81 = vector.extract_strided_slice %72 {offsets = [0, 0], sizes = [1, 4], strides = [1, 1]} : vector<2x4xf32> to vector<1x4xf32>
    %cst_52 = arith.constant 9.99999974E-6 : f32
    %82 = vector.broadcast %cst_52 : f32 to vector<1x4xf32>
    %83 = arith.addf %80, %82 : vector<1x4xf32>
    %84 = math.rsqrt %83 : vector<1x4xf32>
    %85 = arith.mulf %81, %84 : vector<1x4xf32>
    %86 = vector.extract_strided_slice %72 {offsets = [1, 0], sizes = [1, 4], strides = [1, 1]} : vector<2x4xf32> to vector<1x4xf32>
    %87 = arith.mulf %74, %85 : vector<1x4xf32>
    %88 = arith.subf %86, %87 : vector<1x4xf32>
    %c0_53 = arith.constant 0 : index
    %c0_54 = arith.constant 0 : index
    %89 = vector.load %arg11[%c0_53, %c0_54] : memref<4x72xf32, #tpu.memory_space<vmem>>, vector<4x72xf32>
    %cst_55 = arith.constant dense<0.000000e+00> : vector<1x72xf32>
    %90 = tpu.matmul %85, %89, %cst_55 {dimension_numbers = #tpu.dot_dimension_numbers<[1], [0], [0], [1], [0, 0, 1, 1], [], []>} : vector<1x4xf32>, vector<4x72xf32>, vector<1x72xf32> -> vector<1x72xf32>
    %c0_56 = arith.constant 0 : index
    %c0_57 = arith.constant 0 : index
    %91 = vector.load %arg11[%c0_56, %c0_57] : memref<4x72xf32, #tpu.memory_space<vmem>>, vector<4x72xf32>
    %cst_58 = arith.constant dense<0.000000e+00> : vector<1x72xf32>
    %92 = tpu.matmul %88, %91, %cst_58 {dimension_numbers = #tpu.dot_dimension_numbers<[1], [0], [0], [1], [0, 0, 1, 1], [], []>} : vector<1x4xf32>, vector<4x72xf32>, vector<1x72xf32> -> vector<1x72xf32>
    %93 = vector.broadcast %90 : vector<1x72xf32> to vector<36x72xf32>
    %94 = arith.mulf %62, %93 : vector<36x72xf32>
    %95 = vector.broadcast %92 : vector<1x72xf32> to vector<36x72xf32>
    %96 = arith.addf %94, %95 : vector<36x72xf32>
    %cst_59 = arith.constant 0.000000e+00 : f32
    %97 = vector.broadcast %cst_59 : f32 to vector<36x72xf32>
    %98 = arith.cmpf ogt, %96, %97 : vector<36x72xf32>
    %cst_60 = arith.constant 1.000000e-01 : f32
    %99 = vector.broadcast %cst_60 : f32 to vector<36x72xf32>
    %100 = arith.mulf %99, %96 : vector<36x72xf32>
    %101 = arith.select %98, %96, %100 : vector<36x72xi1>, vector<36x72xf32>
    %102 = arith.addf %101, %0 : vector<36x72xf32>
    %c0_61 = arith.constant 0 : index
    %c0_62 = arith.constant 0 : index
    %103 = vector.load %arg12[%c0_61, %c0_62] : memref<36x72xf32, #tpu.memory_space<vmem>>, vector<36x72xf32>
    tpu.vector_store %arg12[%c0_61, %c0_62], %102 {strides = array<i32>} : memref<36x72xf32, #tpu.memory_space<vmem>>, vector<36x72xf32>,
    return
  }
  func.func @transform_0(%arg0: i32) -> (i32, i32) {
    %c0_i32 = arith.constant 0 : i32
    %c0_i32_0 = arith.constant 0 : i32
    %c0_i32_1 = arith.constant 0 : i32
    return %c0_i32, %c0_i32_0 : i32, i32
  }
  func.func @transform_1(%arg0: i32) -> (i32, i32) {
    %c0_i32 = arith.constant 0 : i32
    %c0_i32_0 = arith.constant 0 : i32
    %c0_i32_1 = arith.constant 0 : i32
    return %c0_i32, %c0_i32_0 : i32, i32
  }
  func.func @transform_2(%arg0: i32) -> (i32, i32, i32) {
    %c0_i32 = arith.constant 0 : i32
    %c0_i32_0 = arith.constant 0 : i32
    %c0_i32_1 = arith.constant 0 : i32
    %c0_i32_2 = arith.constant 0 : i32
    return %c0_i32, %c0_i32_0, %c0_i32_1 : i32, i32, i32
  }
  func.func @transform_3(%arg0: i32) -> (i32, i32) {
    %c0_i32 = arith.constant 0 : i32
    %c0_i32_0 = arith.constant 0 : i32
    %c0_i32_1 = arith.constant 0 : i32
    return %c0_i32, %c0_i32_0 : i32, i32
  }
  func.func @transform_4(%arg0: i32) -> (i32, i32) {
    %c0_i32 = arith.constant 0 : i32
    %c0_i32_0 = arith.constant 0 : i32
    %c0_i32_1 = arith.constant 0 : i32
    return %c0_i32, %c0_i32_0 : i32, i32
  }
  func.func @transform_5(%arg0: i32) -> (i32, i32) {
    %c0_i32 = arith.constant 0 : i32
    %c0_i32_0 = arith.constant 0 : i32
    %c0_i32_1 = arith.constant 0 : i32
    return %c0_i32, %c0_i32_0 : i32, i32
  }
  func.func @transform_6(%arg0: i32) -> (i32, i32) {
    %c0_i32 = arith.constant 0 : i32
    %c0_i32_0 = arith.constant 0 : i32
    %c0_i32_1 = arith.constant 0 : i32
    return %c0_i32, %c0_i32_0 : i32, i32
  }
  func.func @transform_7(%arg0: i32) -> (i32, i32) {
    %c0_i32 = arith.constant 0 : i32
    %c0_i32_0 = arith.constant 0 : i32
    %c0_i32_1 = arith.constant 0 : i32
    return %c0_i32, %c0_i32_0 : i32, i32
  }
  func.func @transform_8(%arg0: i32) -> (i32, i32) {
    %c0_i32 = arith.constant 0 : i32
    %c0_i32_0 = arith.constant 0 : i32
    %c0_i32_1 = arith.constant 0 : i32
    return %c0_i32, %c0_i32_0 : i32, i32
  }
  func.func @transform_9(%arg0: i32) -> (i32, i32) {
    %c0_i32 = arith.constant 0 : i32
    %c0_i32_0 = arith.constant 0 : i32
    %c0_i32_1 = arith.constant 0 : i32
    return %c0_i32, %c0_i32_0 : i32, i32
  }
  func.func @transform_10(%arg0: i32) -> (i32, i32) {
    %c0_i32 = arith.constant 0 : i32
    %c0_i32_0 = arith.constant 0 : i32
    %c0_i32_1 = arith.constant 0 : i32
    return %c0_i32, %c0_i32_0 : i32, i32
  }
  func.func @transform_11(%arg0: i32) -> (i32, i32) {
    %c0_i32 = arith.constant 0 : i32
    %c0_i32_0 = arith.constant 0 : i32
    %c0_i32_1 = arith.constant 0 : i32
    return %c0_i32, %c0_i32_0 : i32, i32
  }
}

</mosaic_0001>

<bundles_post_ra>
// kernel: tile.11
= control target key start
LH: loop header
LB: loop body
LE: loop exit
PB: predicated region body
PF: predicated region fallthrough
CT: control target
= control target key end

     0   :  { %vm4_vm0 = vcmask 130048   ;;  %s182_s0 = inlined_call_operand.vmem [shape: f32[2,18,144], index: 0, kind: input, shape index: {}]   ;;  %s183_s1 = inlined_call_operand.vmem [shape: f32[36,144], index: 1, kind: output, shape index: {}]  }
   0x1   :  { %v62_v0 = vld [vmem:[%s182_s0 + $0x8] sm:$0xff]   ;;  %v64_v1 = vld [vmem:[%s182_s0 + $0x18] sm:$0xff]   ;;  %v36_v6 = vld [vmem:[%s182_s0] sm:$0xff]  }
   0x2   :  { %v66_v2 = vld [vmem:[%s182_s0 + $0x28] sm:$0x3]   ;;  %63 = vst.msk [vmem:[%s183_s1 + $0x8] sm:$0xff] %vm4_vm0, %v62_v0   ;;  %65 = vst.msk [vmem:[%s183_s1 + $0x18] sm:$0xff] %vm4_vm0, %v64_v1   ;;  %v68_v3 = vld [vmem:[%s182_s0 + $0x38] sm:$0xff]  }
   0x3   :  { %67 = vst.msk [vmem:[%s183_s1 + $0x28] sm:$0x3] %vm4_vm0, %v66_v2   ;;  %v71_v4 = vld [vmem:[%s182_s0 + $0x48] sm:$0xff]   ;;  %v74_v5 = vld [vmem:[%s182_s0 + $0x58] sm:$0x3]   ;;  %v76_v7 = vld [vmem:[%s182_s0 + $0x10] sm:$0xff]  }
   0x4   :  { %69 = vst.msk [vmem:[%s183_s1 + $0x2a] sm:$0x3f] %vm4_vm0, %v68_v3   ;;  %70 = vst.msk [vmem:[%s183_s1 + $0x32] sm:$0xc0] %vm4_vm0, %v68_v3   ;;  %v78_v8 = vld [vmem:[%s182_s0 + $0x20] sm:$0x3]  }
   0x5   :  { %72 = vst.msk [vmem:[%s183_s1 + $0x3a] sm:$0x3f] %vm4_vm0, %v71_v4   ;;  %73 = vst.msk [vmem:[%s183_s1 + $0x42] sm:$0xc0] %vm4_vm0, %v71_v4   ;;  %v80_v9 = vld [vmem:[%s182_s0 + $0x30] sm:$0xff]   ;;  %v83_v10 = vld [vmem:[%s182_s0 + $0x40] sm:$0xff]  }
   0x6   :  { %75 = vst.msk [vmem:[%s183_s1 + $0x4a] sm:$0x3] %vm4_vm0, %v74_v5   ;;  %37 = vst [vmem:[%s183_s1] sm:$0xff] %v36_v6   ;;  %v86_v11 = vld [vmem:[%s182_s0 + $0x50] sm:$0x3]  }
   0x7   :  { %77 = vst [vmem:[%s183_s1 + $0x10] sm:$0xff] %v76_v7   ;;  %79 = vst [vmem:[%s183_s1 + $0x20] sm:$0x3] %v78_v8  }
   0x8   :  { %81 = vst [vmem:[%s183_s1 + $0x22] sm:$0x3f] %v80_v9   ;;  %82 = vst [vmem:[%s183_s1 + $0x2a] sm:$0xc0] %v80_v9  }
   0x9   :  { %84 = vst [vmem:[%s183_s1 + $0x32] sm:$0x3f] %v83_v10   ;;  %85 = vst [vmem:[%s183_s1 + $0x3a] sm:$0xc0] %v83_v10  }
   0xa   :  { %87 = vst [vmem:[%s183_s1 + $0x42] sm:$0x3] %v86_v11  }

// kernel: tile.15
= control target key start
LH: loop header
LB: loop body
LE: loop exit
PB: predicated region body
PF: predicated region fallthrough
CT: control target
= control target key end

     0   :  { %vm3_vm0 = vcmask 588800   ;;  %s86_s0 = inlined_call_operand.vmem [shape: f32[2,18,72], index: 0, kind: input, shape index: {}]   ;;  %s87_s1 = inlined_call_operand.vmem [shape: f32[36,72], index: 1, kind: output, shape index: {}]  }
   0x1   :  { %v2_v0 = vld [vmem:[%s86_s0] sm:$0xff]   ;;  %v30_v1 = vld [vmem:[%s86_s0 + $0x8] sm:$0xff]   ;;  %v32_v2 = vld [vmem:[%s86_s0 + $0x10] sm:$0x3]  }
   0x2   :  { %4 = vst.msk [vmem:[%s87_s1] sm:$0xff] %vm3_vm0, %v2_v0   ;;  %31 = vst.msk [vmem:[%s87_s1 + $0x8] sm:$0xff] %vm3_vm0, %v30_v1   ;;  %v34_v3 = vld [vmem:[%s86_s0 + $0x18] sm:$0xff]   ;;  %v36_v4 = vld [vmem:[%s86_s0 + $0x20] sm:$0xff]  }
   0x3   :  { %33 = vst.msk [vmem:[%s87_s1 + $0x10] sm:$0x3] %vm3_vm0, %v32_v2   ;;  %v38_v5 = vld [vmem:[%s86_s0 + $0x28] sm:$0x3]   ;;  %35 = vst.msk [vmem:[%s87_s1 + $0x12] sm:$0xff] %vm3_vm0, %v34_v3  }
   0x4   :  { %37 = vst.msk [vmem:[%s87_s1 + $0x1a] sm:$0xff] %vm3_vm0, %v36_v4   ;;  %39 = vst.msk [vmem:[%s87_s1 + $0x22] sm:$0x3] %vm3_vm0, %v38_v5  }

// kernel: darknet_block.1
= control target key start
LH: loop header
LB: loop body
LE: loop exit
PB: predicated region body
PF: predicated region fallthrough
CT: control target
= control target key end

     0   :  { %v1958_v1 = vmov 0   ;;  %vm111_vm0 = vcmask 1043456   ;;  %vm101_vm1 = vcmask 588800   ;;  %v1959_v19 = vmov 0.0|0.0   ;;  %s2687_s1 = inlined_call_operand.vmem [shape: bf16[72,144], index: 1, kind: input, shape index: {}]   ;;  %s2688_s0 = inlined_call_operand.vmem [shape: f32[36,72], index: 0, kind: input, shape index: {}]   ;;  %s2689_s7 = inlined_call_operand.vmem [shape: f32[144,8], index: 7, kind: input, shape index: {}]   ;;  %s2690_s8 = inlined_call_operand.vmem [shape: f32[8,144], index: 8, kind: input, shape index: {}]   ;;  %s2691_s2 = inlined_call_operand.vmem [shape: bf16[3,144,72], index: 2, kind: input, shape index: {}]   ;;  %s2692_s3 = inlined_call_operand.vmem [shape: f32[2,8], index: 3, kind: input, shape index: {}]   ;;  %s2693_s5 = inlined_call_operand.vmem [shape: f32[36,144], index: 5, kind: input, shape index: {}]   ;;  %s2694_s9 = inlined_call_operand.vmem [shape: f32[72,4], index: 9, kind: input, shape index: {}]   ;;  %s2695_s6 = inlined_call_operand.vmem [shape: f32[36,72], index: 6, kind: input, shape index: {}]   ;;  %s2696_s10 = inlined_call_operand.vmem [shape: f32[4,72], index: 10, kind: input, shape index: {}]   ;;  %s2697_s4 = inlined_call_operand.vmem [shape: f32[2,4], index: 4, kind: input, shape index: {}]   ;;  %s2698_s11 = inlined_call_operand.vmem [shape: f32[36,72], index: 11, kind: output, shape index: {}]  }
   0x1   :  { %v1908_v0 = vld [vmem:[%s2687_s1 + $0x4] ss:$8 sps:$4 sm:$0xff]   ;;  %150 = vmatprep.mubr.bf16.mxu0 %v1958_v1  ;;  %v1910_v2 = vld [vmem:[%s2687_s1] ss:$8 sps:$4 sm:$0xff]   ;;  %v1911_v3 = vld [vmem:[%s2687_s1 + $0x14] ss:$8 sps:$4 sm:$0xff]  }
   0x2   :  { %118 = vmatprep.subr.bf16.mxu0 %v1908_v0  ;;  %v1913_v4 = vld [vmem:[%s2687_s1 + $0x10] ss:$8 sps:$4 sm:$0xff]   ;;  %v1914_v5 = vld [vmem:[%s2687_s1 + $0x24] ss:$8 sps:$4 sm:$0xff]   ;;  %v1916_v6 = vld [vmem:[%s2687_s1 + $0x20] ss:$8 sps:$4 sm:$0xff]  }
   0x3   :  { %119 = vmatpush1.bf16.msra.mxu0 %v1910_v2  ;;  %v1917_v7 = vld [vmem:[%s2687_s1 + $0x34] ss:$8 sps:$4 sm:$0xff]   ;;  %v55_v8 = vld [vmem:[%s2687_s1 + $0x40] sm:$0xff]  ;;  %v1919_v9 = vld [vmem:[%s2687_s1 + $0x30] ss:$8 sps:$4 sm:$0xff]   ;;  %vm190_vm2 = vcmask 130048  }
   0x4   :  { %120 = vmatprep.subr.bf16.mxu0 %v1911_v3  ;;  %v1639_v10 = vcombine.high %v55_v8, %v55_v8  ;;  %v1638_v11 = vcombine.low %v55_v8, %v55_v8  ;;  %v39_v12 = vld [vmem:[%s2688_s0] sm:$0xff]  ;;  %v40_v13 = vld [vmem:[%s2688_s0 + $0x8] sm:$0xff]  ;;  %v41_v20 = vld [vmem:[%s2688_s0 + $0x10] sm:$0xff]  ;;  %vm198_vm3 = vcmask 125952   ;;  %vm423_vm4 = vcmask 64512  }
   0x5   :  { %v243_v15 = vld [vmem:[%s2689_s7] sm:$0xff]  ;;  %v244_v16 = vld [vmem:[%s2689_s7 + $0x8] sm:$0xff]  ;;  %v44_v17 = vpack.c.bf16 %v40_v13, %v39_v12  ;;  %v42_v21 = vld [vmem:[%s2688_s0 + $0x18] sm:$0xff]  ;;  %vm665_vm9 = vcmask 1047556  }
   0x6   :  { %v113_v14 = vsel %vm111_vm0, %v1638_v11, 0  ;;  %v2064_v18 = vpack.c.bf16 %v244_v16, %v243_v15  ;;  %v45_v22 = vpack.c.bf16 %v42_v21, %v41_v20  ;;  %v43_v23 = vld [vmem:[%s2688_s0 + $0x20] sm:$0xf]  ;;  %v245_v25 = vld [vmem:[%s2689_s7 + $0x10] sm:$0xff]  ;;  %v246_v26 = vld [vmem:[%s2689_s7 + $0x18] sm:$0xff] }
   0x7   :  { %121 = vmatpush1.bf16.msra.mxu0 %v1913_v4  ;;  %v46_v24 = vpack.c.bf16 %v43_v23, %v43_v23  ;;  %v2089_v27 = vpack.c.bf16 %v246_v26, %v245_v25  ;;  %v247_v28 = vld [vmem:[%s2689_s7 + $0x20] sm:$0xff]  ;;  %v248_v29 = vld [vmem:[%s2689_s7 + $0x28] sm:$0xff]  ;;  %v249_v31 = vld [vmem:[%s2689_s7 + $0x30] sm:$0xff] }
   0x8   :  { %122 = vmatprep.subr.bf16.mxu0 %v1914_v5  ;;  %v2099_v30 = vpack.c.bf16 %v248_v29, %v247_v28  ;;  %v250_v32 = vld [vmem:[%s2689_s7 + $0x38] sm:$0xff]  ;;  %v251_v34 = vld [vmem:[%s2689_s7 + $0x40] sm:$0xff]  ;;  %v252_v35 = vld [vmem:[%s2689_s7 + $0x48] sm:$0xff] }
   0x9   :  { %v2109_v33 = vpack.c.bf16 %v250_v32, %v249_v31  ;;  %v2119_v36 = vpack.c.bf16 %v252_v35, %v251_v34  ;;  %v253_v37 = vld [vmem:[%s2689_s7 + $0x50] sm:$0xff]  ;;  %v254_v38 = vld [vmem:[%s2689_s7 + $0x58] sm:$0xff]  ;;  %v255_v40 = vld [vmem:[%s2689_s7 + $0x60] sm:$0xff] }
   0xa   :  { %v2129_v39 = vpack.c.bf16 %v254_v38, %v253_v37  ;;  %v256_v41 = vld [vmem:[%s2689_s7 + $0x68] sm:$0xff]  ;;  %v257_v43 = vld [vmem:[%s2689_s7 + $0x70] sm:$0xff]  ;;  %v258_v44 = vld [vmem:[%s2689_s7 + $0x78] sm:$0xff] }
   0xb   :  { %123 = vmatpush1.bf16.msra.mxu0 %v1916_v6  ;;  %v2139_v42 = vpack.c.bf16 %v256_v41, %v255_v40  ;;  %v2149_v45 = vpack.c.bf16 %v258_v44, %v257_v43  ;;  %v259_v46 = vld [vmem:[%s2689_s7 + $0x80] sm:$0xff]  ;;  %v260_v47 = vld [vmem:[%s2689_s7 + $0x88] sm:$0xff] }
   0xc   :  { %124 = vmatprep.subr.bf16.mxu0 %v1917_v7  ;;  %v2159_v48 = vpack.c.bf16 %v260_v47, %v259_v46 }
   0xf   :  { %125 = vmatpush1.bf16.msra.mxu0 %v1919_v9 }
  0x10   :  { %1640 = vmatprep.subr.msk.bf16.mxu0 %vm111_vm0, %v1639_v10 }
  0x13   :  { %127 = vmatpush1.bf16.msra.mxu0 %v113_v14 }
  0x14   :  { %1802 = vmatprep.subr.bf16.mxu0 %v1959_v19 }
  0x16   :  { %1641 = vmatmul.mubr.msk.bf16.vlgmr.msra.gmra.mrb[0].mxu0 %vm101_vm1, %v44_v17 }
  0x17   :  { %160 = vmatprep.mubr.bf16.mxu0 %v1958_v1  ;;  %1804 = vmatpush1.bf16.msra.mxu0 %v2064_v18 }
  0x18   :  { %1805 = vmatprep.subr.bf16.mxu0 %v1959_v19 }
  0x1b   :  { %1807 = vmatpush1.bf16.msra.mxu0 %v2089_v27 }
  0x1c   :  { %1808 = vmatprep.subr.bf16.mxu0 %v1959_v19 }
  0x1e   :  { %1642 = vmatmul.mubr.msk.bf16.gmra.mrb[4].mxu0 %vm101_vm1, %v45_v22 }
  0x1f   :  { %170 = vmatprep.mubr.bf16.mxu0 %v1958_v1  ;;  %1810 = vmatpush1.bf16.msra.mxu0 %v2099_v30 }
  0x20   :  { %1811 = vmatprep.subr.bf16.mxu0 %v1959_v19 }
  0x23   :  { %1813 = vmatpush1.bf16.msra.mxu0 %v2109_v33 }
  0x24   :  { %1814 = vmatprep.subr.bf16.mxu0 %v1959_v19 }
  0x26   :  { %1643 = vmatmul.mubr.msk.bf16.gmra.mrb[8].mxu0 %vm101_vm1, %v46_v24 }
  0x27   :  { %1816 = vmatpush1.bf16.msra.mxu0 %v2119_v36 }
  0x28   :  { %1817 = vmatprep.subr.bf16.mxu0 %v1959_v19 }
  0x2b   :  { %1819 = vmatpush1.bf16.msra.mxu0 %v2129_v39 }
  0x2c   :  { %1820 = vmatprep.subr.bf16.mxu0 %v1959_v19 }
  0x2f   :  { %1822 = vmatpush1.bf16.msra.mxu0 %v2139_v42 }
  0x30   :  { %1823 = vmatprep.subr.bf16.mxu0 %v1959_v19 }
  0x33   :  { %1825 = vmatpush1.bf16.msra.mxu0 %v2149_v45 }
  0x34   :  { %1826 = vmatprep.subr.bf16.mxu0 %v1959_v19 }
  0x37   :  { %1828 = vmatpush1.bf16.msra.mxu0 %v2159_v48 }
  0x38   :  { %1829 = vmatprep.subr.bf16.mxu0 %v1959_v19 }
  0xe9   :  { %v2163_v49 = vpop.f32.mrb[0].mxu0 }
  0xea   :  { %v2165_v50 = vpop.f32.mrb[1].mxu0  ;;  %v207_v53 = vmul.f32 %v2163_v49, %v2163_v49 }
  0xeb   :  { %v208_v51 = vmul.f32 %v2165_v50, %v2165_v50  ;;  %v2169_v52 = vpop.f32.mrb[2].mxu0  ;;  %v191_v57 = vsel %vm190_vm2, %v2165_v50, 0.0 }
  0xec   :  { %v179_v54 = vadd.f32 %v2169_v52, %v2163_v49  ;;  %v209_v55 = vmul.f32 %v2169_v52, %v2169_v52  ;;  %v2177_v56 = vpop.f32.mrb[3].mxu0 }
  0xed   :  { %v192_v58 = vsel %vm190_vm2, %v2177_v56, 0.0  ;;  %v210_v59 = vmul.f32 %v2177_v56, %v2177_v56  ;;  %v228_v62 = vsel %vm190_vm2, %v208_v51, 0.0 }
  0xee   :  { %v217_v60 = vadd.f32 %v209_v55, %v207_v53  ;;  %v193_v61 = vadd.f32 %v192_v58, %v191_v57 }
  0xef   :  { %v229_v63 = vsel %vm190_vm2, %v210_v59, 0.0 }
  0xf0   :  { %v230_v0 = vadd.f32 %v229_v63, %v228_v62 }
  0xf1   :  { %v2187_v2 = vpop.f32.mrb[4].mxu0 }
  0xf2   :  { %v180_v3 = vadd.f32 %v179_v54, %v2187_v2  ;;  %v211_v4 = vmul.f32 %v2187_v2, %v2187_v2  ;;  %v2192_v5 = vpop.f32.mrb[5].mxu0 }
  0xf3   :  { %v194_v6 = vsel %vm190_vm2, %v2192_v5, 0.0  ;;  %v212_v7 = vmul.f32 %v2192_v5, %v2192_v5  ;;  %v2198_v8 = vpop.f32.mrb[6].mxu0 }
  0xf4   :  { %v218_v9 = vadd.f32 %v217_v60, %v211_v4  ;;  %v195_v10 = vadd.f32 %v194_v6, %v193_v61  ;;  %v181_v11 = vadd.f32 %v180_v3, %v2198_v8  ;;  %v213_v12 = vmul.f32 %v2198_v8, %v2198_v8  ;;  %v2203_v13 = vpop.f32.mrb[7].mxu0 }
  0xf5   :  { %v231_v14 = vsel %vm190_vm2, %v212_v7, 0.0  ;;  %v196_v15 = vsel %vm190_vm2, %v2203_v13, 0.0  ;;  %v214_v16 = vmul.f32 %v2203_v13, %v2203_v13 }
  0xf6   :  { %v232_v17 = vadd.f32 %v231_v14, %v230_v0  ;;  %v219_v20 = vadd.f32 %v218_v9, %v213_v12  ;;  %v197_v21 = vadd.f32 %v196_v15, %v195_v10 }
  0xf7   :  { %v233_v22 = vsel %vm190_vm2, %v214_v16, 0.0 }
  0xf8   :  { %v234_v23 = vadd.f32 %v233_v22, %v232_v17 }
  0xf9   :  { %v2211_v24 = vpop.f32.mrb[8].mxu0 }
  0xfa   :  { %v182_v25 = vsel %vm111_vm0, %v2211_v24, 0.0  ;;  %v215_v26 = vmul.f32 %v2211_v24, %v2211_v24  ;;  %v2217_v28 = vpop.f32.mrb[9].mxu0 }
  0xfb   :  { %v183_v29 = vadd.f32 %v182_v25, %v181_v11  ;;  %v199_v31 = vsel %vm198_vm3, %v2217_v28, 0.0  ;;  %v216_v32 = vmul.f32 %v2217_v28, %v2217_v28  ;;  %v176_v34 = vpop.f32.mrb[10].mxu0 }
  0xfc   :  { %v220_v35 = vsel %vm111_vm0, %v215_v26, 0.0  ;;  %v200_v37 = vadd.f32 %v199_v31, %v197_v21  ;;  %v177_v38 = vpop.f32.mrb[11].mxu0  ;;  %v407_v21 = vld [vmem:[%s2692_s3] sm:$0x3]  ;;  %v1922_v31 = vld [vmem:[%s2691_s2 + $0x48] sm:$0xff]   ;;  %v1923_v34 = vld [vmem:[%s2691_s2 + $0x50] sm:$0xff]  }
  0xfd   :  { %v184_v40 = vrot.slane %v183_v29, 4  ;;  %v221_v41 = vadd.f32 %v220_v35, %v219_v20  ;;  %v235_v43 = vsel %vm198_vm3, %v216_v32, 0.0  ;;  %v1924_v35 = vld [vmem:[%s2691_s2 + $0x58] sm:$0xff]   ;;  %v1926_v38 = vld [vmem:[%s2691_s2 + $0x68] sm:$0xff]   ;;  %vm850_vm3 = vsmask.f32 6400 }
  0xfe   :  { %v201_v44 = vrot.slane %v200_v37, 4  ;;  %v236_v46 = vadd.f32 %v235_v43, %v234_v23  ;;  %v1929_v43 = vld [vmem:[%s2691_s2 + $0x80] sm:$0xff]  }
  0xff   :  { %v185_v47 = vadd.f32 %v184_v40, %v183_v29  ;;  %v222_v7 = vrot.slane %v221_v41, 4  ;;  %v1927_v40 = vld [vmem:[%s2691_s2 + $0x70] sm:$0xff]  }
 0x100   :  { %v202_v51 = vadd.f32 %v201_v44, %v200_v37  ;;  %v237_v53 = vrot.slane %v236_v46, 4  ;;  %v1925_v37 = vld [vmem:[%s2691_s2 + $0x60] sm:$0xff]   ;;  %v1930_v44 = vld [vmem:[%s2691_s2 + $0x88] sm:$0xff]  }
 0x101   :  { %v186_v54 = vrot.slane %v185_v47, 2 }
 0x102   :  { %v203_v55 = vrot.slane %v202_v51, 2  ;;  %v238_v57 = vadd.f32 %v237_v53, %v236_v46  ;;  %v573_v46 = vlaneseq }
 0x103   :  { %v187_v58 = vadd.f32 %v186_v54, %v185_v47 }
 0x104   :  { %v204_v59 = vadd.f32 %v203_v55, %v202_v51  ;;  %v239_v60 = vrot.slane %v238_v57, 2  ;;  %v574_v47 = vshrl.u32 %v573_v46, 7  ;;  %v643_v46 = vld [vmem:[%s2693_s5 + $0x20] sm:$0xff] }
 0x105   :  { %v188_v61 = vrot.slane %v187_v58, 1 }
 0x106   :  { %v205_v62 = vrot.slane %v204_v59, 1  ;;  %v240_v63 = vadd.f32 %v239_v60, %v238_v57  ;;  %v2291_v51 = vsub.s32 0, %v574_v47  ;;  %v645_v47 = vld [vmem:[%s2693_s5 + $0x30] sm:$0xff] }
 0x107   :  { %v189_v4 = vadd.f32 %v188_v61, %v187_v58 }
 0x108   :  { %v206_v0 = vadd.f32 %v205_v62, %v204_v59  ;;  %v241_v3 = vrot.slane %v240_v63, 1 }
 0x10a   :  { %1644 = vmatprep.mubr.msk.f32.mxu0 %vm190_vm2, %v206_v0  ;;  %v242_v6 = vadd.f32 %v241_v3, %v240_v63 }
 0x10b   :  { %329 = vmatmul.mubr.f32.vlgmr.msra.gmra.mrb[12].mxu0 %v189_v4 }
 0x10c   :  { %1831 = vmatpush1.bf16.msra.mxu0 %v2064_v18  ;;  %1645 = vmatprep.mubr.msk.f32.mxu0 %vm190_vm2, %v242_v6  ;;  %v223_v18 = vadd.f32 %v222_v7, %v221_v41  ;;  %v1928_v41 = vld [vmem:[%s2691_s2 + $0x78] sm:$0xff]  }
 0x10d   :  { %1832 = vmatprep.subr.bf16.mxu0 %v1959_v19 }
 0x10e   :  { %v224_v9 = vrot.slane %v223_v18, 2 }
 0x110   :  { %1834 = vmatpush1.bf16.msra.mxu0 %v2089_v27  ;;  %v225_v27 = vadd.f32 %v224_v9, %v223_v18 }
 0x111   :  { %1835 = vmatprep.subr.bf16.mxu0 %v1959_v19 }
 0x114   :  { %1837 = vmatpush1.bf16.msra.mxu0 %v2099_v30  ;;  %v226_v30 = vrot.slane %v225_v27, 1 }
 0x115   :  { %1838 = vmatprep.subr.bf16.mxu0 %v1959_v19 }
 0x118   :  { %1840 = vmatpush1.bf16.msra.mxu0 %v2109_v33  ;;  %v227_v33 = vadd.f32 %v226_v30, %v225_v27  ;;  %v642_v30 = vld [vmem:[%s2693_s5 + $0x18] sm:$0xff] }
 0x119   :  { %1841 = vmatprep.subr.bf16.mxu0 %v1959_v19 }
 0x11c   :  { %1843 = vmatpush1.bf16.msra.mxu0 %v2119_v36  ;;  %v422_v36 = vld [vmem:[%s2690_s8 + $0x8] sm:$0xff] }
 0x11d   :  { %1844 = vmatprep.subr.bf16.mxu0 %v1959_v19  ;;  %427 = vmatprep.subr.mxu1 %v422_v36 }
 0x120   :  { %1846 = vmatpush1.bf16.msra.mxu0 %v2129_v39  ;;  %v421_v39 = vld [vmem:[%s2690_s8] sm:$0xff] }
 0x121   :  { %1847 = vmatprep.subr.bf16.mxu0 %v1959_v19  ;;  %428 = vmatpush1.msra.mxu1 %v421_v39 }
 0x122   :  { %502 = vmatprep.subr.mxu1 %v422_v36  ;;  %v639_v36 = vld [vmem:[%s2693_s5] sm:$0xff] }
 0x124   :  { %1849 = vmatpush1.bf16.msra.mxu0 %v2139_v42  ;;  %v1960_v42 = vmov 0.0  }
 0x125   :  { %1850 = vmatprep.subr.bf16.mxu0 %v1959_v19  ;;  %491 = vmatprep.mubr.f32.mxu1 %v1960_v42 }
 0x128   :  { %1852 = vmatpush1.bf16.msra.mxu0 %v2149_v45 }
 0x129   :  { %1853 = vmatprep.subr.bf16.mxu0 %v1959_v19 }
 0x12c   :  { %1855 = vmatpush1.bf16.msra.mxu0 %v2159_v48 }
 0x12d   :  { %1856 = vmatprep.subr.bf16.mxu0 %v1959_v19 }
 0x12f   :  { %402 = vmatmul.mubr.f32.vlgmr.msra.gmra.mrb[14].mxu0 %v227_v33 }
 0x1de   :  { %v330_v45 = vpop.f32.mrb[12].mxu0 }
 0x1df   :  { %v332_v48 = vpop.f32.mrb[13].mxu0  ;;  %v408_v10 = vmul.f32 0.001953125, %v330_v45 }
 0x1e1   :  { %v410_v12 = vmul.f32 %v408_v10, %v408_v10 }
 0x202   :  { %v403_v11 = vpop.f32.mrb[14].mxu0 }
 0x203   :  { %v409_v14 = vmul.f32 0.001953125, %v403_v11  ;;  %v405_v15 = vpop.f32.mrb[15].mxu0  ;;  %v641_v11 = vld [vmem:[%s2693_s5 + $0x10] sm:$0xff] }
 0x205   :  { %v411_v16 = vsub.f32 %v409_v14, %v410_v12 }
 0x207   :  { %v412_v17 = vmax.f32 %v411_v16, 0.0 }
 0x209   :  { %v413_v20 = vadd.f32 1e-05, %v412_v17 }
 0x20b   :  { %1949 = vrsqrt.f32 %v413_v20 }
 0x215   :  { %v1950_v22 = vpop.eup %1949 }
 0x216   :  { %v415_v23 = vmul.f32 %v1950_v22, %v407_v21 }
 0x218   :  { %v416_v25 = vmul.f32 %v415_v23, %v408_v10  ;;  %1646 = vmatmul.mubr.msk.f32.vlgmr.msra.gmra.mrb[0].mxu1 %vm423_vm4, %v415_v23  ;;  %v644_v23 = vld [vmem:[%s2693_s5 + $0x28] sm:$0xff] }
 0x219   :  { %503 = vmatpush1.msra.mxu1 %v421_v39  ;;  %566 = vmatprep.mubr.f32.mxu1 %v1960_v42 }
 0x21a   :  { %v418_v26 = vrot.slane %v416_v25, 7  ;;  %794 = vmatprep.subr.bf16.mxu1 %v1958_v1  ;;  %v646_v25 = vld [vmem:[%s2693_s5 + $0x38] sm:$0xff] }
 0x21c   :  { %v420_v29 = vsub.f32 %v407_v21, %v418_v26 }
 0x21e   :  { %v499_v32 = vrot.slane %v420_v29, 1 }
 0x220   :  { %1647 = vmatmul.mubr.msk.f32.vlgmr.msra.gmra.mrb[2].mxu1 %vm423_vm4, %v499_v32  ;;  %vm1044_vm4 = vsmask.f32 7424 }
 0x221   :  { %795 = vmatpush1.bf16.msra.mxu1 %v1922_v31 }
 0x222   :  { %796 = vmatprep.subr.bf16.mxu1 %v1958_v1 }
 0x225   :  { %797 = vmatpush1.bf16.msra.mxu1 %v1923_v34 }
 0x226   :  { %798 = vmatprep.subr.bf16.mxu1 %v1958_v1 }
 0x229   :  { %799 = vmatpush1.bf16.msra.mxu1 %v1924_v35 }
 0x22a   :  { %800 = vmatprep.subr.bf16.mxu1 %v1958_v1 }
 0x22d   :  { %801 = vmatpush1.bf16.msra.mxu1 %v1925_v37  ;;  %v1931_v37 = vld [vmem:[%s2691_s2] sm:$0xff]  }
 0x22e   :  { %802 = vmatprep.subr.bf16.mxu1 %v1958_v1 }
 0x231   :  { %803 = vmatpush1.bf16.msra.mxu1 %v1926_v38 }
 0x232   :  { %804 = vmatprep.subr.bf16.mxu1 %v1958_v1 }
 0x235   :  { %805 = vmatpush1.bf16.msra.mxu1 %v1927_v40 }
 0x236   :  { %806 = vmatprep.subr.bf16.mxu1 %v1958_v1 }
 0x239   :  { %807 = vmatpush1.bf16.msra.mxu1 %v1928_v41 }
 0x23a   :  { %808 = vmatprep.subr.bf16.mxu1 %v1958_v1 }
 0x23d   :  { %809 = vmatpush1.bf16.msra.mxu1 %v1929_v43 }
 0x23e   :  { %810 = vmatprep.subr.bf16.mxu1 %v1958_v1 }
 0x241   :  { %811 = vmatpush1.bf16.msra.mxu1 %v1930_v44 }
 0x242   :  { %969 = vmatprep.subr.bf16.mxu1 %v1958_v1 }
 0x2eb   :  { %v493_v53 = vpop.f32.mrb[0].mxu1 }
 0x2ec   :  { %v576_v54 = vrot.slane %v493_v53, %v2291_v51  ;;  %v495_v55 = vpop.f32.mrb[1].mxu1 }
 0x2ed   :  { %v580_v57 = vrot.slane %v495_v55, %v2291_v51 }
 0x2ee   :  { %v581_v58 = vmul.f32 %v576_v54, %v2163_v49  ;;  %v583_v59 = vmul.f32 %v576_v54, %v2169_v52  ;;  %v585_v60 = vmul.f32 %v576_v54, %v2187_v2  ;;  %v587_v61 = vmul.f32 %v576_v54, %v2198_v8 }
 0x2ef   :  { %v2300_v62 = vmul.f32 %v576_v54, %v2211_v24  ;;  %v582_v63 = vmul.f32 %v580_v57, %v2165_v50  ;;  %v584_v0 = vmul.f32 %v580_v57, %v2177_v56  ;;  %v586_v3 = vmul.f32 %v580_v57, %v2192_v5 }
 0x2f0   :  { %v588_v4 = vmul.f32 %v580_v57, %v2203_v13  ;;  %v590_v6 = vmul.f32 %v580_v57, %v2217_v28  ;;  %v640_v28 = vld [vmem:[%s2693_s5 + $0x8] sm:$0xff] }
 0x2f3   :  { %v568_v49 = vpop.f32.mrb[2].mxu1 }
 0x2f4   :  { %v2308_v52 = vrot.slane %v568_v49, %v2291_v51  ;;  %v570_v2 = vpop.f32.mrb[3].mxu1 }
 0x2f5   :  { %v598_v8 = vrot.slane %v570_v2, %v2291_v51 }
 0x2f6   :  { %v599_v24 = vadd.f32 %v2308_v52, %v581_v58  ;;  %v601_v7 = vadd.f32 %v2308_v52, %v583_v59  ;;  %v603_v50 = vadd.f32 %v2308_v52, %v585_v60  ;;  %v605_v56 = vadd.f32 %v2308_v52, %v587_v61  ;;  %v1932_v61 = vld [vmem:[%s2691_s2 + $0x8] sm:$0xff]  }
 0x2f7   :  { %v600_v5 = vadd.f32 %v598_v8, %v582_v63  ;;  %v602_v18 = vadd.f32 %v598_v8, %v584_v0  ;;  %v604_v13 = vadd.f32 %v598_v8, %v586_v3  ;;  %v606_v9 = vadd.f32 %v598_v8, %v588_v4  ;;  %v648_v4 = vld [vmem:[%s2693_s5 + $0x48] sm:$0xf] }
 0x2f8   :  { %v2318_v27 = vadd.f32 %v598_v8, %v590_v6  ;;  %vm609_vm5 = vcmp.gt.f32.partialorder %v599_v24, 0.0  ;;  %vm611_vm6 = vcmp.gt.f32.partialorder %v601_v7, 0.0  ;;  %v619_v33 = vmul.f32 0.1, %v599_v24 }
 0x2f9   :  { %vm610_vm7 = vcmp.gt.f32.partialorder %v600_v5, 0.0  ;;  %vm612_vm8 = vcmp.gt.f32.partialorder %v602_v18, 0.0  ;;  %v620_v39 = vmul.f32 0.1, %v600_v5  ;;  %v622_v45 = vmul.f32 0.1, %v602_v18 }
 0x2fa   :  { %v621_v48 = vmul.f32 0.1, %v601_v7  ;;  %v629_v10 = vsel %vm609_vm5, %v599_v24, %v619_v33  ;;  %vm614_vm10 = vcmp.gt.f32.partialorder %v604_v13, 0.0  ;;  %vm616_vm11 = vcmp.gt.f32.partialorder %v606_v9, 0.0 }
 0x2fb   :  { %v630_v12 = vsel %vm610_vm7, %v600_v5, %v620_v39  ;;  %v632_v14 = vsel %vm612_vm8, %v602_v18, %v622_v45  ;;  %v2329_v15 = vmul.f32 %v639_v36, %v629_v10  ;;  %v624_v16 = vmul.f32 0.1, %v604_v13 }
 0x2fc   :  { %v2331_v17 = vmul.f32 %v640_v28, %v630_v12  ;;  %v652_v20 = vmul.f32 %v642_v30, %v632_v14  ;;  %v631_v21 = vsel %vm611_vm6, %v601_v7, %v621_v48  ;;  %v626_v22 = vmul.f32 0.1, %v606_v9 }
 0x2fd   :  { %v651_v26 = vmul.f32 %v641_v11, %v631_v21  ;;  %v666_v29 = vrot.slane %v2329_v15, 4  ;;  %v634_v31 = vsel %vm614_vm10, %v604_v13, %v624_v16  ;;  %vm613_vm12 = vcmp.gt.f32.partialorder %v603_v50, 0.0  ;;  %v647_v13 = vld [vmem:[%s2693_s5 + $0x40] sm:$0xf]  ;;  %v1934_v21 = vld [vmem:[%s2691_s2 + $0x18] sm:$0xff]  }
 0x2fe   :  { %v2342_v32 = vpack.c.bf16 %v652_v20, %v2331_v17  ;;  %v668_v34 = vrot.slane %v2331_v17, 4  ;;  %v671_v35 = vrot.slane %v652_v20, 4  ;;  %v636_v38 = vsel %vm616_vm11, %v606_v9, %v626_v22  ;;  %v1933_v9 = vld [vmem:[%s2691_s2 + $0x10] sm:$0xff]  }
 0x2ff   :  { %v2350_v40 = vpack.c.bf16 %v651_v26, %v2329_v15  ;;  %v670_v41 = vrot.slane %v651_v26, 4  ;;  %v654_v43 = vmul.f32 %v644_v23, %v634_v31  ;;  %v2352_v44 = vmul.f32 %v646_v25, %v636_v38 }
 0x300   :  { %1675 = vmatprep.mubr.msk.bf16.mxu1 %vm190_vm2, %v2342_v32  ;;  %vm615_vm13 = vcmp.gt.f32.partialorder %v605_v56, 0.0  ;;  %v623_v53 = vmul.f32 0.1, %v603_v50  ;;  %v625_v54 = vmul.f32 0.1, %v605_v56  ;;  %vm618_vm14 = vcmp.gt.f32.partialorder %v2318_v27, 0.0 }
 0x301   :  { %827 = vmatmul.mubr.bf16.vlgmr.msra.gmra.mrb[4].mxu1 %v2350_v40  ;;  %v1046_v55 = vshrl.u32 %v2350_v40, 16  ;;  %v1048_v57 = vshll.u32 %v2350_v40, 16  ;;  %v2367_v58 = vpack.c.bf16 %v2352_v44, %v654_v43  ;;  %v673_v59 = vrot.slane %v654_v43, 4 }
 0x302   :  { %970 = vmatpush1.bf16.msra.mxu1 %v1931_v37  ;;  %v675_v60 = vrot.slane %v2352_v44, 4  ;;  %v633_v63 = vsel %vm613_vm12, %v603_v50, %v623_v53  ;;  %v635_v0 = vsel %vm615_vm13, %v605_v56, %v625_v54  ;;  %v628_v3 = vmul.f32 0.1, %v2318_v27 }
 0x303   :  { %1676 = vmatprep.mubr.msk.bf16.mxu1 %vm190_vm2, %v2367_v58  ;;  %971 = vmatprep.subr.bf16.mxu1 %v1958_v1  ;;  %v653_v6 = vmul.f32 %v643_v46, %v633_v63  ;;  %v2381_v49 = vmul.f32 %v645_v47, %v635_v0  ;;  %v607_v2 = vadd.f32 %v2308_v52, %v2300_v62  ;;  %v1057_v8 = vshrl.u32 %v2342_v32, 16 }
 0x304   :  { %v638_v24 = vsel %vm618_vm14, %v2318_v27, %v628_v3  ;;  %v678_v7 = vsel %vm665_vm9, %v670_v41, %v666_v29  ;;  %v679_v50 = vsel %vm665_vm9, %v671_v35, %v668_v34  ;;  %v681_v56 = vsel %vm665_vm9, %v673_v59, %v671_v35 }
 0x305   :  { %v2395_v5 = vpack.c.bf16 %v2381_v49, %v653_v6  ;;  %v672_v18 = vrot.slane %v653_v6, 4  ;;  %v674_v62 = vrot.slane %v2381_v49, 4  ;;  %v658_v52 = vmul.f32 %v648_v4, %v638_v24 }
 0x306   :  { %972 = vmatpush1.bf16.msra.mxu1 %v1932_v61  ;;  %vm617_vm15 = vcmp.gt.f32.partialorder %v607_v2, 0.0  ;;  %v627_v28 = vmul.f32 0.1, %v607_v2  ;;  %v683_v27 = vsel %vm665_vm9, %v675_v60, %v673_v59  ;;  %v1059_v30 = vshll.u32 %v2342_v32, 16  ;;  %v1935_v61 = vld [vmem:[%s2691_s2 + $0x20] sm:$0xff]  }
 0x307   :  { %973 = vmatprep.subr.bf16.mxu1 %v1958_v1  ;;  %v680_v33 = vsel %vm665_vm9, %v672_v18, %v670_v41  ;;  %v682_v36 = vsel %vm665_vm9, %v674_v62, %v672_v18  ;;  %v1053_v39 = vshll.u32 %v2395_v5, 16  ;;  %v664_v45 = vpack.c.bf16 %v658_v52, %v658_v52 }
 0x308   :  { %v688_v48 = vpack.c.bf16 %v682_v36, %v680_v33  ;;  %v2413_v10 = vsel %vm665_vm9, %v668_v34, %v658_v52  ;;  %v637_v11 = vsel %vm617_vm15, %v607_v2, %v627_v28  ;;  %v689_v12 = vpack.c.bf16 %v683_v27, %v681_v56 }
 0x309   :  { %835 = vmatmul.mubr.bf16.gmra.mrb[8].mxu1 %v2395_v5  ;;  %v2416_v14 = vrot.slane %v1053_v39, 1  ;;  %v677_v16 = vrot.slane %v2413_v10, 4  ;;  %v657_v17 = vmul.f32 %v647_v13, %v637_v11  ;;  %v687_v20 = vpack.c.bf16 %v679_v50, %v2413_v10 }
 0x30a   :  { %974 = vmatpush1.bf16.msra.mxu1 %v1933_v9  ;;  %1677 = vmatprep.mubr.msk.bf16.mxu1 %vm190_vm2, %v664_v45  ;;  %v877_v22 = vshrl.u32 %v689_v12, 16  ;;  %v880_v23 = vshll.u32 %v689_v12, 16  ;;  %v860_v25 = vshrl.u32 %v688_v48, 16  ;;  %v863_v26 = vshll.u32 %v688_v48, 16 }
 0x30b   :  { %975 = vmatprep.subr.bf16.mxu1 %v1958_v1  ;;  %v663_v31 = vpack.c.bf16 %v657_v17, %v657_v17  ;;  %v667_v34 = vsel %vm665_vm9, %v666_v29, %v657_v17  ;;  %v869_v35 = vshrl.u32 %v687_v20, 16  ;;  %v872_v37 = vshll.u32 %v687_v20, 16 }
 0x30c   :  { %v676_v38 = vrot.slane %v667_v34, 4  ;;  %v686_v41 = vpack.c.bf16 %v678_v7, %v667_v34  ;;  %v879_v43 = vrot.slane %v877_v22, 1  ;;  %v882_v46 = vrot.slane %v880_v23, 2 }
 0x30d   :  { %v871_v47 = vrot.slane %v869_v35, 1  ;;  %v874_v53 = vrot.slane %v872_v37, 2  ;;  %v862_v54 = vrot.slane %v860_v25, 1  ;;  %v865_v59 = vrot.slane %v863_v26, 2  ;;  %v1939_v37 = vld [vmem:[%s2691_s2 + $0x40] sm:$0xff]  }
 0x30e   :  { %976 = vmatpush1.bf16.msra.mxu1 %v1934_v21  ;;  %v883_v63 = vor.u32 %v882_v46, %v879_v43  ;;  %v852_v0 = vshrl.u32 %v686_v41, 16  ;;  %v855_v15 = vshll.u32 %v686_v41, 16  ;;  %v685_v29 = vsel %vm665_vm9, %v677_v16, %v675_v60  ;;  %v1936_v60 = vld [vmem:[%s2691_s2 + $0x28] sm:$0xff]   ;;  %v1942_v41 = vld [vmem:[%s2691_s2 + $0xa0] sm:$0xff]   ;;  %v1944_v46 = vld [vmem:[%s2691_s2 + $0xb0] sm:$0xff]  }
 0x30f   :  { %977 = vmatprep.subr.bf16.mxu1 %v1958_v1  ;;  %v875_v3 = vor.u32 %v874_v53, %v871_v47  ;;  %v866_v4 = vor.u32 %v865_v59, %v862_v54  ;;  %v691_v6 = vpack.c.bf16 %v685_v29, %v685_v29  ;;  %v684_v49 = vsel %vm665_vm9, %v676_v38, %v674_v62  ;;  %v1941_v38 = vld [vmem:[%s2691_s2 + $0x98] sm:$0xff]   ;;  %v1943_v43 = vld [vmem:[%s2691_s2 + $0xa8] sm:$0xff]   ;;  %v1946_v53 = vld [vmem:[%s2691_s2 + $0xc0] sm:$0xff]  }
 0x310   :  { %v854_v2 = vrot.slane %v852_v0, 1  ;;  %v857_v24 = vrot.slane %v855_v15, 2  ;;  %v690_v7 = vpack.c.bf16 %v684_v49, %v684_v49  ;;  %v1061_v50 = vrot.slane %v1059_v30, 1  ;;  %v1945_v47 = vld [vmem:[%s2691_s2 + $0xb8] sm:$0xff]   ;;  %v1947_v54 = vld [vmem:[%s2691_s2 + $0xc8] sm:$0xff]   ;;  %v1948_v59 = vld [vmem:[%s2691_s2 + $0xd0] sm:$0xff]  }
 0x311   :  { %843 = vmatmul.mubr.bf16.gmra.mrb[12].mxu1 %v663_v31  ;;  %v884_v56 = vsel %vm850_vm3, %v875_v3, %v883_v63  ;;  %v895_v18 = vshrl.u32 %v691_v6, 16  ;;  %v898_v52 = vshll.u32 %v691_v6, 16  ;;  %v1063_v44 = vshll.u32 %v2367_v58, 16  ;;  %v1938_v31 = vld [vmem:[%s2691_s2 + $0x38] sm:$0xff]   ;;  %v1262_v29 = vld [vmem:[%s2694_s9] sm:$0xff]  ;;  %v1264_v3 = vld [vmem:[%s2694_s9 + $0x10] sm:$0xff] }
 0x312   :  { %978 = vmatpush1.bf16.msra.mxu1 %v1935_v61  ;;  %1687 = vmatprep.mubr.msk.bf16.mxu1 %vm190_vm2, %v884_v56  ;;  %v858_v13 = vor.u32 %v857_v24, %v854_v2  ;;  %v886_v62 = vshrl.u32 %v690_v7, 16  ;;  %v889_v9 = vshll.u32 %v690_v7, 16  ;;  %v1062_v28 = vor.u32 %v1061_v50, %v1057_v8  ;;  %v1265_v6 = vld [vmem:[%s2694_s9 + $0x18] sm:$0xff]  ;;  %v1266_v2 = vld [vmem:[%s2694_s9 + $0x20] sm:$0xff]  ;;  %v1267_v24 = vld [vmem:[%s2694_s9 + $0x28] sm:$0xff] }
 0x313   :  { %979 = vmatprep.subr.bf16.mxu1 %v1958_v1  ;;  %v897_v27 = vrot.slane %v895_v18, 1  ;;  %v900_v30 = vrot.slane %v898_v52, 2  ;;  %v1065_v33 = vrot.slane %v1063_v44, 1  ;;  %v1050_v36 = vrot.slane %v1048_v57, 1  ;;  %v1937_v57 = vld [vmem:[%s2691_s2 + $0x30] sm:$0xff]   ;;  %v1269_v56 = vld [vmem:[%s2694_s9 + $0x38] sm:$0xff] }
 0x314   :  { %v867_v39 = vsel %vm850_vm3, %v858_v13, %v866_v4  ;;  %v888_v45 = vrot.slane %v886_v62, 1  ;;  %v891_v48 = vrot.slane %v889_v9, 2  ;;  %v2450_v11 = vpack.c.bf16 %v2413_v10, %v2413_v10  ;;  %v1268_v50 = vld [vmem:[%s2694_s9 + $0x30] sm:$0xff]  ;;  %v2564_v52 = vld [vmem:[%s2694_s9 + $0x40] sm:$0xff]  ;;  %v1217_v62 = vld [vmem:[%s2695_s6 + $0x8] sm:$0xff] }
 0x315   :  { %v901_v12 = vor.u32 %v900_v30, %v897_v27  ;;  %v1066_v32 = vsel %vm1044_vm4, %v1062_v28, %v1065_v33  ;;  %v1051_v8 = vor.u32 %v1050_v36, %v1046_v55  ;;  %v1075_v16 = vshrl.u32 %v2367_v58, 16  ;;  %v1216_v28 = vld [vmem:[%s2695_s6] sm:$0xff]  ;;  %v1218_v30 = vld [vmem:[%s2695_s6 + $0x10] sm:$0xff] }
 0x316   :  { %980 = vmatpush1.bf16.msra.mxu1 %v1936_v60  ;;  %v892_v17 = vor.u32 %v891_v48, %v888_v45  ;;  %v1079_v20 = vshll.u32 %v2450_v11, 16  ;;  %v692_v21 = vpack.c.bf16 %v667_v34, %v667_v34  ;;  %v1067_v10 = vshrl.u32 %v2395_v5, 16 }
 0x317   :  { %981 = vmatprep.subr.bf16.mxu1 %v1958_v1  ;;  %v902_v22 = vsel %vm850_vm3, %v883_v63, %v901_v12  ;;  %v1056_v40 = vsel %vm1044_vm4, %v1051_v8, %v2416_v14  ;;  %v1077_v55 = vor.u32 %v1075_v16, %v1065_v33  ;;  %v1086_v61 = vshrl.u32 %v2450_v11, 16 }
 0x318   :  { %v893_v58 = vsel %vm850_vm3, %v866_v4, %v892_v17  ;;  %v1081_v23 = vrot.slane %v1079_v20, 1  ;;  %v1069_v25 = vor.u32 %v1067_v10, %v2416_v14  ;;  %v1071_v26 = vshll.u32 %v692_v21, 16  ;;  %v1940_v14 = vld [vmem:[%s2691_s2 + $0x90] sm:$0xff]  }
 0x319   :  { %v1083_v0 = vshrl.u32 %v692_v21, 16  ;;  %vm1961_vm5 = vmmov 0   ;;  %v2536_v49 = vpack.c.bf16 %v1265_v6, %v1264_v3  ;;  %v2546_v7 = vpack.c.bf16 %v1267_v24, %v1266_v2 }
 0x31a   :  { %982 = vmatpush1.bf16.msra.mxu1 %v1937_v57  ;;  %v1082_v5 = vsel %vm1044_vm4, %v1077_v55, %v1081_v23  ;;  %v1073_v34 = vrot.slane %v1071_v26, 1  ;;  %v1088_v63 = vor.u32 %v1086_v61, %v1081_v23  ;;  %1768 = vmatprep.mubr.msk.f32.mxu0 %vm1961_vm5, %v1960_v42  ;;  %v2556_v18 = vpack.c.bf16 %v1269_v56, %v1268_v50 }
 0x31b   :  { %983 = vmatprep.subr.bf16.mxu1 %v1958_v1  ;;  %vm1432_vm6 = vcmask 31744  }
 0x31c   :  { %v1074_v35 = vsel %vm1044_vm4, %v1069_v25, %v1073_v34  ;;  %v1085_v15 = vor.u32 %v1083_v0, %v1073_v34 }
 0x31e   :  { %984 = vmatpush1.bf16.msra.mxu1 %v1938_v31 }
 0x31f   :  { %985 = vmatprep.subr.bf16.mxu1 %v1958_v1 }
 0x322   :  { %986 = vmatpush1.bf16.msra.mxu1 %v1939_v37 }
 0x323   :  { %1155 = vmatprep.subr.bf16.mxu1 %v1958_v1 }
 0x325   :  { %1002 = vmatmul.mubr.bf16.vlgmr.msra.gmra.mrb[4].mxu1 %v867_v39  ;;  %v1219_v39 = vld [vmem:[%s2695_s6 + $0x18] sm:$0xff] }
 0x326   :  { %1688 = vmatprep.mubr.msk.bf16.mxu1 %vm190_vm2, %v902_v22  ;;  %1156 = vmatpush1.bf16.msra.mxu1 %v1940_v14 }
 0x327   :  { %1157 = vmatprep.subr.bf16.mxu1 %v1958_v1 }
 0x32a   :  { %1158 = vmatpush1.bf16.msra.mxu1 %v1941_v38 }
 0x32b   :  { %1159 = vmatprep.subr.bf16.mxu1 %v1958_v1 }
 0x32d   :  { %1010 = vmatmul.mubr.bf16.gmra.mrb[8].mxu1 %v893_v58 }
 0x32e   :  { %1689 = vmatprep.mubr.msk.bf16.mxu1 %vm190_vm2, %v901_v12  ;;  %1160 = vmatpush1.bf16.msra.mxu1 %v1942_v41 }
 0x32f   :  { %1161 = vmatprep.subr.bf16.mxu1 %v1958_v1 }
 0x332   :  { %1162 = vmatpush1.bf16.msra.mxu1 %v1943_v43 }
 0x333   :  { %1163 = vmatprep.subr.bf16.mxu1 %v1958_v1 }
 0x335   :  { %1018 = vmatmul.mubr.bf16.gmra.mrb[12].mxu1 %v892_v17 }
 0x336   :  { %1164 = vmatpush1.bf16.msra.mxu1 %v1944_v46  ;;  %1717 = vmatprep.mubr.msk.bf16.mxu1 %vm190_vm2, %v1066_v32 }
 0x337   :  { %1165 = vmatprep.subr.bf16.mxu1 %v1958_v1 }
 0x33a   :  { %1166 = vmatpush1.bf16.msra.mxu1 %v1945_v47 }
 0x33b   :  { %1167 = vmatprep.subr.bf16.mxu1 %v1958_v1 }
 0x33e   :  { %1168 = vmatpush1.bf16.msra.mxu1 %v1946_v53 }
 0x33f   :  { %1169 = vmatprep.subr.bf16.mxu1 %v1958_v1 }
 0x342   :  { %1170 = vmatpush1.bf16.msra.mxu1 %v1947_v54 }
 0x343   :  { %1171 = vmatprep.subr.bf16.mxu1 %v1958_v1  ;;  %v1263_v1 = vld [vmem:[%s2694_s9 + $0x8] sm:$0xff] }
 0x344   :  { %v2530_v4 = vpack.c.bf16 %v1263_v1, %v1262_v29 }
 0x346   :  { %1172 = vmatpush1.bf16.msra.mxu1 %v1948_v59  ;;  %1858 = vmatpush3.bf16.msra.mxu0 %v2530_v4 }
 0x347   :  { %1859 = vmatprep.subr.bf16.mxu0 %v1959_v19 }
 0x349   :  { %1188 = vmatmul.mubr.bf16.vlgmr.msra.gmra.mrb[4].mxu1 %v1056_v40  ;;  %v1220_v40 = vld [vmem:[%s2695_s6 + $0x20] sm:$0xf] }
 0x34a   :  { %1718 = vmatprep.mubr.msk.bf16.mxu1 %vm190_vm2, %v1082_v5  ;;  %1861 = vmatpush3.bf16.msra.mxu0 %v2536_v49 }
 0x34b   :  { %1862 = vmatprep.subr.bf16.mxu0 %v1959_v19 }
 0x34e   :  { %1864 = vmatpush3.bf16.msra.mxu0 %v2546_v7 }
 0x34f   :  { %1865 = vmatprep.subr.bf16.mxu0 %v1959_v19 }
 0x351   :  { %1196 = vmatmul.mubr.bf16.gmra.mrb[8].mxu1 %v1074_v35 }
 0x352   :  { %1719 = vmatprep.mubr.msk.bf16.mxu1 %vm190_vm2, %v1088_v63  ;;  %1867 = vmatpush3.bf16.msra.mxu0 %v2556_v18  ;;  %vm1233_vm2 = vcmask 584704  }
 0x353   :  { %1766 = vmatprep.subr.mxu0 %v1960_v42 }
 0x356   :  { %1767 = vmatpush3.msra.mxu0 %v2564_v52 }
 0x357   :  { %1868 = vmatprep.subr.bf16.mxu0 %v1959_v19 }
 0x359   :  { %1204 = vmatmul.mubr.bf16.gmra.mrb[12].mxu1 %v1085_v15 }
 0x41c   :  { %v1189_v44 = vpop.f32.mrb[4].mxu1 }
 0x41d   :  { %v1191_v60 = vpop.f32.mrb[5].mxu1  ;;  %v2579_v33 = vmul.f32 %v1216_v28, %v1189_v44 }
 0x41e   :  { %v1192_v13 = vpop.f32.mrb[6].mxu1 }
 0x41f   :  { %v1194_v9 = vpop.f32.mrb[7].mxu1  ;;  %v2574_v27 = vmul.f32 %v1217_v62, %v1192_v13  ;;  %v1226_v32 = vsel %vm101_vm1, %v2579_v33, 0.0  ;;  %v1242_v21 = vmul.f32 %v2579_v33, %v2579_v33 }
 0x421   :  { %v1227_v45 = vsel %vm101_vm1, %v2574_v27, 0.0  ;;  %v1243_v8 = vmul.f32 %v2574_v27, %v2574_v27  ;;  %v1247_v25 = vsel %vm101_vm1, %v1242_v21, 0.0 }
 0x422   :  { %v1228_v20 = vadd.f32 %v1227_v45, %v1226_v32 }
 0x423   :  { %v1248_v55 = vsel %vm101_vm1, %v1243_v8, 0.0 }
 0x424   :  { %v1197_v36 = vpop.f32.mrb[8].mxu1  ;;  %v1249_v35 = vadd.f32 %v1248_v55, %v1247_v25 }
 0x425   :  { %v2586_v48 = vmul.f32 %v1218_v30, %v1197_v36  ;;  %v1199_v11 = vpop.f32.mrb[9].mxu1  ;;  %v1417_v30 = vld [vmem:[%s2697_s4] sm:$0x3] }
 0x426   :  { %v1200_v12 = vpop.f32.mrb[10].mxu1 }
 0x427   :  { %v1229_v16 = vsel %vm101_vm1, %v2586_v48, 0.0  ;;  %v2594_v57 = vmul.f32 %v1219_v39, %v1200_v12  ;;  %v1202_v17 = vpop.f32.mrb[11].mxu1  ;;  %v1244_v10 = vmul.f32 %v2586_v48, %v2586_v48 }
 0x428   :  { %v1230_v22 = vadd.f32 %v1229_v16, %v1228_v20 }
 0x429   :  { %v1231_v58 = vsel %vm101_vm1, %v2594_v57, 0.0  ;;  %v1250_v26 = vsel %vm101_vm1, %v1244_v10, 0.0  ;;  %v1245_v31 = vmul.f32 %v2594_v57, %v2594_v57 }
 0x42a   :  { %v1232_v37 = vadd.f32 %v1231_v58, %v1230_v22  ;;  %v1251_v46 = vadd.f32 %v1250_v26, %v1249_v35 }
 0x42b   :  { %v1252_v53 = vsel %vm101_vm1, %v1245_v31, 0.0 }
 0x42c   :  { %v1205_v23 = vpop.f32.mrb[12].mxu1  ;;  %v1253_v61 = vadd.f32 %v1252_v53, %v1251_v46  ;;  %v1954_v46 = vld [vmem:[%s2688_s0 + $0x8] sm:$0xff]  ;;  %v1955_v53 = vld [vmem:[%s2688_s0 + $0x10] sm:$0xff] }
 0x42d   :  { %v2610_v5 = vmul.f32 %v1220_v40, %v1205_v23  ;;  %v1207_v34 = vpop.f32.mrb[13].mxu1 }
 0x42e   :  { %v1208_v14 = vpop.f32.mrb[14].mxu1 }
 0x42f   :  { %v1234_v38 = vsel %vm1233_vm2, %v2610_v5, 0.0  ;;  %v1246_v41 = vmul.f32 %v2610_v5, %v2610_v5  ;;  %v1209_v43 = vpop.f32.mrb[15].mxu1 }
 0x430   :  { %v1235_v47 = vadd.f32 %v1234_v38, %v1232_v37 }
 0x431   :  { %v1254_v59 = vsel %vm1233_vm2, %v1246_v41, 0.0  ;;  %v1953_v41 = vld [vmem:[%s2688_s0] sm:$0xff] }
 0x432   :  { %v1236_v54 = vrot.slane %v1235_v47, 4  ;;  %v1255_v15 = vadd.f32 %v1254_v59, %v1253_v61  ;;  %v1956_v59 = vld [vmem:[%s2688_s0 + $0x18] sm:$0xff] }
 0x434   :  { %v1237_v63 = vadd.f32 %v1236_v54, %v1235_v47  ;;  %v1256_v3 = vrot.slane %v1255_v15, 4 }
 0x436   :  { %v1238_v0 = vrot.slane %v1237_v63, 2  ;;  %v1257_v2 = vadd.f32 %v1256_v3, %v1255_v15 }
 0x438   :  { %v1239_v29 = vadd.f32 %v1238_v0, %v1237_v63  ;;  %v1258_v24 = vrot.slane %v1257_v2, 2  ;;  %v1957_v63 = vld [vmem:[%s2688_s0 + $0x20] sm:$0xf] }
 0x43a   :  { %v1240_v1 = vrot.slane %v1239_v29, 1  ;;  %v1259_v50 = vadd.f32 %v1258_v24, %v1257_v2 }
 0x43c   :  { %v1241_v6 = vadd.f32 %v1240_v1, %v1239_v29  ;;  %v1260_v56 = vrot.slane %v1259_v50, 1 }
 0x43e   :  { %1769 = vmatmul.mubr.msk.f32.vlgmr.msra.gmra.mrb[16].mxu0 %vm101_vm1, %v1241_v6 }
 0x43f   :  { %1870 = vmatpush3.bf16.msra.mxu0 %v2530_v4  ;;  %1789 = vmatprep.mubr.msk.f32.mxu0 %vm1961_vm5, %v1960_v42  ;;  %v1261_v4 = vadd.f32 %v1260_v56, %v1259_v50 }
 0x440   :  { %1871 = vmatprep.subr.bf16.mxu0 %v1959_v19 }
 0x443   :  { %1873 = vmatpush3.bf16.msra.mxu0 %v2536_v49  ;;  %v1431_v49 = vld [vmem:[%s2696_s10] sm:$0xf] }
 0x444   :  { %1874 = vmatprep.subr.bf16.mxu0 %v1959_v19 }
 0x447   :  { %1876 = vmatpush3.bf16.msra.mxu0 %v2546_v7 }
 0x448   :  { %1877 = vmatprep.subr.bf16.mxu0 %v1959_v19 }
 0x44b   :  { %1879 = vmatpush3.bf16.msra.mxu0 %v2556_v18 }
 0x44c   :  { %1787 = vmatprep.subr.mxu0 %v1960_v42 }
 0x44f   :  { %1788 = vmatpush3.msra.mxu0 %v2564_v52 }
 0x450   :  { %1790 = vmatmul.mubr.msk.f32.vlgmr.msra.gmra.mrb[18].mxu0 %vm101_vm1, %v1261_v4  ;;  %1792 = vmatprep.subr.mxu0 %v1960_v42 }
 0x451   :  { %1794 = vmatprep.mubr.msk.f32.mxu0 %vm1961_vm5, %v1960_v42  ;;  %1793 = vmatpush3.msk.msra.mxu0 %vm111_vm0, %v1431_v49 }
 0x452   :  { %1797 = vmatprep.subr.mxu0 %v1960_v42 }
 0x511   :  { %v1340_v19 = vpop.f32.mrb[16].mxu0 }
 0x512   :  { %v1770_v7 = vpop.f32.mrb[17].mxu0  ;;  %v1418_v18 = vmul.f32 0.001953125, %v1340_v19 }
 0x514   :  { %v1420_v52 = vmul.f32 %v1418_v18, %v1418_v18 }
 0x523   :  { %v1413_v44 = vpop.f32.mrb[18].mxu0 }
 0x524   :  { %v1419_v60 = vmul.f32 0.001953125, %v1413_v44  ;;  %v1791_v13 = vpop.f32.mrb[19].mxu0 }
 0x526   :  { %v1421_v62 = vsub.f32 %v1419_v60, %v1420_v52 }
 0x528   :  { %v1422_v9 = vmax.f32 %v1421_v62, 0.0 }
 0x52a   :  { %v1423_v28 = vadd.f32 1e-05, %v1422_v9 }
 0x52c   :  { %1951 = vrsqrt.f32 %v1423_v28 }
 0x536   :  { %v1952_v36 = vpop.eup %1951 }
 0x537   :  { %v1425_v39 = vmul.f32 %v1952_v36, %v1417_v30 }
 0x539   :  { %v1426_v45 = vmul.f32 %v1425_v39, %v1418_v18  ;;  %1795 = vmatmul.mubr.msk.f32.vlgmr.msra.gmra.mrb[20].mxu0 %vm1432_vm6, %v1425_v39 }
 0x53a   :  { %1798 = vmatpush3.msk.msra.mxu0 %vm111_vm0, %v1431_v49  ;;  %1799 = vmatprep.mubr.msk.f32.mxu0 %vm1961_vm5, %v1960_v42 }
 0x53b   :  { %v1428_v11 = vrot.slane %v1426_v45, 7 }
 0x53d   :  { %v1430_v12 = vsub.f32 %v1417_v30, %v1428_v11 }
 0x53f   :  { %v1510_v32 = vrot.slane %v1430_v12, 1 }
 0x541   :  { %1800 = vmatmul.mubr.msk.f32.vlgmr.msra.gmra.mrb[22].mxu0 %vm1432_vm6, %v1510_v32 }
 0x60c   :  { %v1505_v8 = vpop.f32.mrb[20].mxu0 }
 0x60d   :  { %v1796_v16 = vpop.f32.mrb[21].mxu0  ;;  %v1586_v17 = vrot.slane %v1505_v8, %v2291_v51 }
 0x60f   :  { %v1587_v20 = vmul.f32 %v1586_v17, %v2579_v33  ;;  %v1588_v10 = vmul.f32 %v1586_v17, %v2574_v27  ;;  %v1589_v22 = vmul.f32 %v1586_v17, %v2586_v48  ;;  %v1590_v40 = vmul.f32 %v1586_v17, %v2594_v57 }
 0x610   :  { %v1591_v58 = vmul.f32 %v1586_v17, %v2610_v5 }
 0x614   :  { %v1579_v21 = vpop.f32.mrb[22].mxu0 }
 0x615   :  { %v1595_v55 = vrot.slane %v1579_v21, %v2291_v51  ;;  %v1801_v42 = vpop.f32.mrb[23].mxu0 }
 0x617   :  { %v1596_v23 = vadd.f32 %v1595_v55, %v1587_v20  ;;  %v1597_v25 = vadd.f32 %v1595_v55, %v1588_v10  ;;  %v1598_v26 = vadd.f32 %v1595_v55, %v1589_v22  ;;  %v1599_v31 = vadd.f32 %v1595_v55, %v1590_v40 }
 0x618   :  { %v1600_v34 = vadd.f32 %v1595_v55, %v1591_v58 }
 0x619   :  { %vm1601_vm0 = vcmp.gt.f32.partialorder %v1596_v23, 0.0  ;;  %vm1602_vm7 = vcmp.gt.f32.partialorder %v1597_v25, 0.0  ;;  %vm1603_vm8 = vcmp.gt.f32.partialorder %v1598_v26, 0.0  ;;  %vm1604_vm9 = vcmp.gt.f32.partialorder %v1599_v31, 0.0 }
 0x61a   :  { %vm1605_vm10 = vcmp.gt.f32.partialorder %v1600_v34, 0.0  ;;  %v1606_v27 = vmul.f32 0.1, %v1596_v23  ;;  %v1607_v33 = vmul.f32 0.1, %v1597_v25 }
 0x61b   :  { %v1608_v48 = vmul.f32 0.1, %v1598_v26  ;;  %v1609_v35 = vmul.f32 0.1, %v1599_v31  ;;  %v1610_v57 = vmul.f32 0.1, %v1600_v34 }
 0x61c   :  { %v1611_v37 = vsel %vm1601_vm0, %v1596_v23, %v1606_v27  ;;  %v1612_v51 = vsel %vm1602_vm7, %v1597_v25, %v1607_v33 }
 0x61d   :  { %v1613_v14 = vsel %vm1603_vm8, %v1598_v26, %v1608_v48  ;;  %v1614_v38 = vsel %vm1604_vm9, %v1599_v31, %v1609_v35  ;;  %v1615_v5 = vsel %vm1605_vm10, %v1600_v34, %v1610_v57  ;;  %v1616_v43 = vadd.f32 %v1953_v41, %v1611_v37 }
 0x61e   :  { %v1617_v47 = vadd.f32 %v1954_v46, %v1612_v51  ;;  %v1618_v54 = vadd.f32 %v1955_v53, %v1613_v14  ;;  %v1619_v61 = vadd.f32 %v1956_v59, %v1614_v38  ;;  %v1620_v0 = vadd.f32 %v1957_v63, %v1615_v5 }
 0x61f   :  { %1621 = vst.msk [vmem:[%s2698_s11] sm:$0xff] %vm101_vm1, %v1616_v43 }
 0x620   :  { %1622 = vst.msk [vmem:[%s2698_s11 + $0x8] sm:$0xff] %vm101_vm1, %v1617_v47  ;;  %1623 = vst.msk [vmem:[%s2698_s11 + $0x10] sm:$0xff] %vm101_vm1, %v1618_v54 }
 0x621   :  { %1624 = vst.msk [vmem:[%s2698_s11 + $0x18] sm:$0xff] %vm101_vm1, %v1619_v61 }
 0x622   :  { %1625 = vst.msk [vmem:[%s2698_s11 + $0x20] sm:$0xf] %vm1233_vm2, %v1620_v0 }

</bundles_post_ra>
